<compile_context>
chip_gen: v7x
topology: tpu7x:2x2x1
jax: 0.10.0
libtpu: 0.0.40
codegen_flags: <defaults>
</compile_context>

<pallas_src>
import functools

import jax
import jax.numpy as jnp
from jax import lax
from jax.experimental import pallas as pl
from jax.experimental.pallas import tpu as pltpu


# ----------------------------------------------------------------------------
# Pass 1: conv (stride 1, groups 1, SAME autopad) + fused partial BN statistics
# ----------------------------------------------------------------------------
def _conv_stats_kernel(x_ref, w_ref, y_ref, stats_ref, *, K, Wp, Wo, RS,
                       mxu_dtype):
    # x_ref:     (1, Hp*Wp, Cin)    pre-padded, row-flattened NHWC image
    # w_ref:     (K*K*Cin, Cpad)    im2col weights, Cout zero-padded to 128
    # y_ref:     (1, Cout, RS*Wo)   channel-major conv-output strip (f32)
    # stats_ref: (1, 1, 2, Cpad)    row 0: per-channel sum, row 1: sum of sq.
    Cout = y_ref.shape[1]
    s = pl.program_id(1)
    row0 = s * (RS * Wp)          # first padded-input flat row of this strip

    # Build the im2col patch for RS output rows.  Every tap is a contiguous
    # sublane-only slice of the flat padded image (no relayout-heavy 3D
    # slicing, no wrap-around garbage columns anywhere).
    rows = []
    for lho in range(RS):
        taps = []
        for kh in range(K):
            for kw in range(K):
                start = row0 + (lho + kh) * Wp + kw
                taps.append(x_ref[0, pl.ds(start, Wo), :])       # (Wo, Cin)
        rows.append(jnp.concatenate(taps, axis=1))               # (Wo, K*K*Cin)
    patch = jnp.concatenate(rows, axis=0)                        # (RS*Wo, KKC)

    # One MXU dot per strip with an f32 register accumulator (single store
    # into y_ref below — no output-Ref read-modify-write).
    acc = jnp.dot(patch.astype(mxu_dtype), w_ref[...].astype(mxu_dtype),
                  preferred_element_type=jnp.float32)            # (RS*Wo, Cpad)

    # Fused BN partial statistics straight from the register accumulator
    # (cross-sublane reductions ride the XLU slot).
    stats_ref[0, 0] = jnp.concatenate(
        [jnp.sum(acc, axis=0, keepdims=True),
         jnp.sum(acc * acc, axis=0, keepdims=True)], axis=0)     # (2, Cpad)

    # Channel-major store: XLU transpose, keep only the real Cout sublanes.
    y_ref[0] = acc.T[:Cout, :]                                   # (Cout, RS*Wo)


# ----------------------------------------------------------------------------
# Pass 2: lane-dense BN apply on the channel-major layout: out = y*scale+shift
# ----------------------------------------------------------------------------
def _bn_apply_kernel(y_ref, scale_ref, shift_ref, o_ref):
    # y_ref: (1, Cout, PS) f32;  scale/shift: (Cout, 1) f32, lane-broadcast.
    o_ref[...] = (y_ref[...] * scale_ref[...] + shift_ref[...]).astype(o_ref.dtype)


# ----------------------------------------------------------------------------
# Tiling helpers
# ----------------------------------------------------------------------------
def _divisors(n):
    return [d for d in range(1, n + 1) if n % d == 0]


def _pick_row_strip(Ho, Wo, max_pixels=512):
    """Smallest divisor RS of Ho with RS*Wo lane-dense (%128 == 0) and bounded.

    Fallback is the whole image: the output block's last dim then equals the
    full pixel dim (always a legal BlockSpec) and stays channel-compact, so it
    can never explode into the giant padded slab the old fallback produced.
    TODO(synk): very wide rows (Wo*128-lcm > max_pixels) would need column
    splitting with masked edge strips; not required for these shapes."""
    cands = [d for d in _divisors(Ho)
             if (d * Wo) % 128 == 0 and d * Wo <= max_pixels]
    return min(cands) if cands else Ho


def _pick_pixel_strip(P, target=1024):
    """Largest multiple-of-128 divisor of P below target; else the full dim."""
    cands = [d for d in _divisors(P) if d % 128 == 0 and d <= target]
    return max(cands) if cands else P


# ----------------------------------------------------------------------------
# Wrapper: NCHW in -> NCHW out (matches PyTorch convention)
# ----------------------------------------------------------------------------
@functools.partial(jax.jit, static_argnames=("stride", "eps", "mxu_bf16"))
def conv_bn_forward(x_nchw, w_oihw, gamma, beta, *, stride=1, eps=1e-5,
                    mxu_bf16=False):
    # mxu_bf16=True casts the MXU operands to bf16 (recommended on v5e/v6e at
    # production channel counts; accumulation stays f32).  Default False keeps
    # bit-accurate f32 math for the tolerance check below.
    assert stride == 1, "only stride=1 supported (module default s=None -> 1)"
    N, Cin, H, W = x_nchw.shape
    Cout, Cin_g, K, K2 = w_oihw.shape
    assert K == K2 and Cin_g == Cin  # groups == 1

    p = K // 2                              # autopad(k, None)
    Ho = H + 2 * p - K + 1
    Wo = W + 2 * p - K + 1
    Hp, Wp = H + 2 * p, W + 2 * p
    P = Ho * Wo                             # valid output pixels per image
    KKC = K * K * Cin
    Cpad = ((Cout + 127) // 128) * 128      # lane-dense MXU output width
    mxu_dtype = jnp.bfloat16 if mxu_bf16 else x_nchw.dtype

    # Boundary layout plumbing (one fused XLA op over the small input):
    # NCHW -> NHWC, zero-pad H/W, flatten rows -> (N, Hp*Wp, Cin).
    x = jnp.transpose(x_nchw, (0, 2, 3, 1))
    x = jnp.pad(x, ((0, 0), (p, p), (p, p), (0, 0)))
    x = x.reshape(N, Hp * Wp, Cin)
    # im2col weights: OIHW -> (kh, kw, ci, co) -> (K*K*Cin, Cout) -> pad lanes.
    w = jnp.transpose(w_oihw, (2, 3, 1, 0)).reshape(KKC, Cout).astype(mxu_dtype)
    w = jnp.pad(w, ((0, 0), (0, Cpad - Cout)))

    RS = _pick_row_strip(Ho, Wo)            # output rows per pass-1 grid step
    NS = Ho // RS

    conv_kernel = functools.partial(_conv_stats_kernel, K=K, Wp=Wp, Wo=Wo,
                                    RS=RS, mxu_dtype=mxu_dtype)
    y_cm, stats = pl.pallas_call(
        conv_kernel,
        out_shape=(jax.ShapeDtypeStruct((N, Cout, P), jnp.float32),
                   jax.ShapeDtypeStruct((N, NS, 2, Cpad), jnp.float32)),
        grid_spec=pltpu.PrefetchScalarGridSpec(
            num_scalar_prefetch=0,
            grid=(N, NS),
            in_specs=[
                # whole (tiny) padded image; only re-DMA'd when n changes
                pl.BlockSpec((1, Hp * Wp, Cin), lambda n, s: (n, 0, 0)),
                pl.BlockSpec((KKC, Cpad), lambda n, s: (0, 0)),
            ],
            out_specs=[
                pl.BlockSpec((1, Cout, RS * Wo), lambda n, s: (n, 0, s)),
                pl.BlockSpec((1, 1, 2, Cpad), lambda n, s: (n, s, 0, 0)),
            ],
        ),
        compiler_params=pltpu.CompilerParams(
            dimension_semantics=("parallel", "parallel"),
            vmem_limit_bytes=32 * 1024 * 1024),
    )(x, w)

    # Combine the tiny fused partial stats in f32 (training-mode biased var).
    # TODO(synk): single-pass E[x^2]-E[x]^2 can cancel for large-mean channels;
    # switch to a Welford-style combination if tolerances tighten.
    count = jnp.float32(N * P)
    csum = jnp.sum(stats[:, :, 0, :Cout], axis=(0, 1))
    csq = jnp.sum(stats[:, :, 1, :Cout], axis=(0, 1))
    mean = csum / count
    var = jnp.maximum(csq / count - mean * mean, 0.0)
    inv = lax.rsqrt(var + eps)
    scale_v = gamma.astype(jnp.float32) * inv
    shift_v = beta.astype(jnp.float32) - mean * scale_v
    scale = scale_v.reshape(Cout, 1)
    shift = shift_v.reshape(Cout, 1)

    # Pass 2: tiled, lane-dense BN apply writing the final NCHW layout.
    PS = _pick_pixel_strip(P)
    out_cm = pl.pallas_call(
        _bn_apply_kernel,
        out_shape=jax.ShapeDtypeStruct((N, Cout, P), x_nchw.dtype),
        grid_spec=pltpu.PrefetchScalarGridSpec(
            num_scalar_prefetch=0,
            grid=(N, P // PS),
            in_specs=[
                pl.BlockSpec((1, Cout, PS), lambda n, s: (n, 0, s)),
                pl.BlockSpec((Cout, 1), lambda n, s: (0, 0)),
                pl.BlockSpec((Cout, 1), lambda n, s: (0, 0)),
            ],
            out_specs=pl.BlockSpec((1, Cout, PS), lambda n, s: (n, 0, s)),
        ),
        compiler_params=pltpu.CompilerParams(
            dimension_semantics=("parallel", "parallel"),
            vmem_limit_bytes=32 * 1024 * 1024),
    )(y_cm, scale, shift)

    # (N, Cout, Ho*Wo) -> (N, Cout, Ho, Wo): trailing-dim split, free in XLA.
    return out_cm.reshape(N, Cout, Ho, Wo)


# ----------------------------------------------------------------------------
# Pure-JAX reference for validation
# ----------------------------------------------------------------------------
def conv_bn_reference(x_nchw, w_oihw, gamma, beta, *, eps=1e-5):
    K = w_oihw.shape[-1]
    p = K // 2
    y = lax.conv_general_dilated(
        x_nchw.astype(jnp.float32), w_oihw.astype(jnp.float32),
        window_strides=(1, 1), padding=[(p, p), (p, p)],
        dimension_numbers=("NCHW", "OIHW", "NCHW"))
    mean = jnp.mean(y, axis=(0, 2, 3), keepdims=True)
    var = jnp.mean(jnp.square(y - mean), axis=(0, 2, 3), keepdims=True)
    out = (y - mean) * lax.rsqrt(var + eps)
    return out * gamma.reshape(1, -1, 1, 1) + beta.reshape(1, -1, 1, 1)


if __name__ == "__main__":
    # Small shapes consistent with the module: ConvBn(in_c=4, out_c=8, k=3, s=1)
    N, Cin, H, W = 2, 4, 16, 16
    Cout, K = 8, 3

    key = jax.random.PRNGKey(0)
    kx, kw, kg, kb = jax.random.split(key, 4)
    x = jax.random.normal(kx, (N, Cin, H, W), dtype=jnp.float32)
    w = jax.random.normal(kw, (Cout, Cin, K, K), dtype=jnp.float32) * 0.1
    gamma = 1.0 + 0.1 * jax.random.normal(kg, (Cout,), dtype=jnp.float32)
    beta = 0.1 * jax.random.normal(kb, (Cout,), dtype=jnp.float32)

    out = conv_bn_forward(x, w, gamma, beta, stride=1, eps=1e-5)
    out = jax.block_until_ready(out)

    ref = conv_bn_reference(x, w, gamma, beta, eps=1e-5)
    assert out.shape == (N, Cout, H, W), out.shape
    err = float(jnp.max(jnp.abs(out - ref)))
    assert jnp.allclose(out, ref, atol=1e-4, rtol=1e-4), err

    print("KERNEL_OK")
</pallas_src>

<mosaic_0001>
module attributes {stable_mosaic.version = 11 : i64} {
  func.func @_conv_stats_kernel(%arg0: i32, %arg1: i32, %arg2: memref<1x324x4xf32, #tpu.memory_space<vmem>>, %arg3: memref<36x128xf32, #tpu.memory_space<vmem>>, %arg4: memref<1x8x128xf32, #tpu.memory_space<vmem>>, %arg5: memref<1x1x2x128xf32, #tpu.memory_space<vmem>>) attributes {dimension_semantics = [#tpu.dimension_semantics<parallel>, #tpu.dimension_semantics<parallel>], iteration_bounds = array<i64: 2, 2>, scalar_prefetch = 0 : i64, scratch_operands = 0 : i64, tpu.core_type = #tpu.core_type<tc>, window_params = [{transform_indices = @transform_0, window_bounds = array<i64: 1, 324, 4>}, {pipeline_mode = #tpu.pipeline_mode<synchronous>, transform_indices = @transform_1, window_bounds = array<i64: 36, 128>}, {transform_indices = @transform_2, window_bounds = array<i64: 1, 8, 128>}, {transform_indices = @transform_3, window_bounds = array<i64: 1, 1, 2, 128>}]} {
    %c144_i32 = arith.constant 144 : i32
    %0 = arith.muli %arg1, %c144_i32 : i32
    %c0_i32 = arith.constant 0 : i32
    %1 = arith.addi %0, %c0_i32 : i32
    %c0_i32_0 = arith.constant 0 : i32
    %2 = arith.addi %1, %c0_i32_0 : i32
    %c0 = arith.constant 0 : index
    %3 = arith.index_cast %2 : i32 to index
    %c0_1 = arith.constant 0 : index
    %4 = vector.load %arg2[%c0, %3, %c0_1] : memref<1x324x4xf32, #tpu.memory_space<vmem>>, vector<1x16x4xf32>
    %5 = vector.shape_cast %4 : vector<1x16x4xf32> to vector<16x4xf32>
    %c0_i32_2 = arith.constant 0 : i32
    %6 = arith.addi %0, %c0_i32_2 : i32
    %c1_i32 = arith.constant 1 : i32
    %7 = arith.addi %6, %c1_i32 : i32
    %c0_3 = arith.constant 0 : index
    %8 = arith.index_cast %7 : i32 to index
    %c0_4 = arith.constant 0 : index
    %9 = vector.load %arg2[%c0_3, %8, %c0_4] : memref<1x324x4xf32, #tpu.memory_space<vmem>>, vector<1x16x4xf32>
    %10 = vector.shape_cast %9 : vector<1x16x4xf32> to vector<16x4xf32>
    %c0_i32_5 = arith.constant 0 : i32
    %11 = arith.addi %0, %c0_i32_5 : i32
    %c2_i32 = arith.constant 2 : i32
    %12 = arith.addi %11, %c2_i32 : i32
    %c0_6 = arith.constant 0 : index
    %13 = arith.index_cast %12 : i32 to index
    %c0_7 = arith.constant 0 : index
    %14 = vector.load %arg2[%c0_6, %13, %c0_7] : memref<1x324x4xf32, #tpu.memory_space<vmem>>, vector<1x16x4xf32>
    %15 = vector.shape_cast %14 : vector<1x16x4xf32> to vector<16x4xf32>
    %c18_i32 = arith.constant 18 : i32
    %16 = arith.addi %0, %c18_i32 : i32
    %c0_i32_8 = arith.constant 0 : i32
    %17 = arith.addi %16, %c0_i32_8 : i32
    %c0_9 = arith.constant 0 : index
    %18 = arith.index_cast %17 : i32 to index
    %c0_10 = arith.constant 0 : index
    %19 = vector.load %arg2[%c0_9, %18, %c0_10] : memref<1x324x4xf32, #tpu.memory_space<vmem>>, vector<1x16x4xf32>
    %20 = vector.shape_cast %19 : vector<1x16x4xf32> to vector<16x4xf32>
    %c18_i32_11 = arith.constant 18 : i32
    %21 = arith.addi %0, %c18_i32_11 : i32
    %c1_i32_12 = arith.constant 1 : i32
    %22 = arith.addi %21, %c1_i32_12 : i32
    %c0_13 = arith.constant 0 : index
    %23 = arith.index_cast %22 : i32 to index
    %c0_14 = arith.constant 0 : index
    %24 = vector.load %arg2[%c0_13, %23, %c0_14] : memref<1x324x4xf32, #tpu.memory_space<vmem>>, vector<1x16x4xf32>
    %25 = vector.shape_cast %24 : vector<1x16x4xf32> to vector<16x4xf32>
    %c18_i32_15 = arith.constant 18 : i32
    %26 = arith.addi %0, %c18_i32_15 : i32
    %c2_i32_16 = arith.constant 2 : i32
    %27 = arith.addi %26, %c2_i32_16 : i32
    %c0_17 = arith.constant 0 : index
    %28 = arith.index_cast %27 : i32 to index
    %c0_18 = arith.constant 0 : index
    %29 = vector.load %arg2[%c0_17, %28, %c0_18] : memref<1x324x4xf32, #tpu.memory_space<vmem>>, vector<1x16x4xf32>
    %30 = vector.shape_cast %29 : vector<1x16x4xf32> to vector<16x4xf32>
    %c36_i32 = arith.constant 36 : i32
    %31 = arith.addi %0, %c36_i32 : i32
    %c0_i32_19 = arith.constant 0 : i32
    %32 = arith.addi %31, %c0_i32_19 : i32
    %c0_20 = arith.constant 0 : index
    %33 = arith.index_cast %32 : i32 to index
    %c0_21 = arith.constant 0 : index
    %34 = vector.load %arg2[%c0_20, %33, %c0_21] : memref<1x324x4xf32, #tpu.memory_space<vmem>>, vector<1x16x4xf32>
    %35 = vector.shape_cast %34 : vector<1x16x4xf32> to vector<16x4xf32>
    %c36_i32_22 = arith.constant 36 : i32
    %36 = arith.addi %0, %c36_i32_22 : i32
    %c1_i32_23 = arith.constant 1 : i32
    %37 = arith.addi %36, %c1_i32_23 : i32
    %c0_24 = arith.constant 0 : index
    %38 = arith.index_cast %37 : i32 to index
    %c0_25 = arith.constant 0 : index
    %39 = vector.load %arg2[%c0_24, %38, %c0_25] : memref<1x324x4xf32, #tpu.memory_space<vmem>>, vector<1x16x4xf32>
    %40 = vector.shape_cast %39 : vector<1x16x4xf32> to vector<16x4xf32>
    %c36_i32_26 = arith.constant 36 : i32
    %41 = arith.addi %0, %c36_i32_26 : i32
    %c2_i32_27 = arith.constant 2 : i32
    %42 = arith.addi %41, %c2_i32_27 : i32
    %c0_28 = arith.constant 0 : index
    %43 = arith.index_cast %42 : i32 to index
    %c0_29 = arith.constant 0 : index
    %44 = vector.load %arg2[%c0_28, %43, %c0_29] : memref<1x324x4xf32, #tpu.memory_space<vmem>>, vector<1x16x4xf32>
    %45 = vector.shape_cast %44 : vector<1x16x4xf32> to vector<16x4xf32>
    %46 = tpu.concatenate %5, %10, %15, %20, %25, %30, %35, %40, %45 in 1 : vector<16x4xf32>, vector<16x4xf32>, vector<16x4xf32>, vector<16x4xf32>, vector<16x4xf32>, vector<16x4xf32>, vector<16x4xf32>, vector<16x4xf32>, vector<16x4xf32> -> vector<16x36xf32>
    %c18_i32_30 = arith.constant 18 : i32
    %47 = arith.addi %0, %c18_i32_30 : i32
    %c0_i32_31 = arith.constant 0 : i32
    %48 = arith.addi %47, %c0_i32_31 : i32
    %c0_32 = arith.constant 0 : index
    %49 = arith.index_cast %48 : i32 to index
    %c0_33 = arith.constant 0 : index
    %50 = vector.load %arg2[%c0_32, %49, %c0_33] : memref<1x324x4xf32, #tpu.memory_space<vmem>>, vector<1x16x4xf32>
    %51 = vector.shape_cast %50 : vector<1x16x4xf32> to vector<16x4xf32>
    %c18_i32_34 = arith.constant 18 : i32
    %52 = arith.addi %0, %c18_i32_34 : i32
    %c1_i32_35 = arith.constant 1 : i32
    %53 = arith.addi %52, %c1_i32_35 : i32
    %c0_36 = arith.constant 0 : index
    %54 = arith.index_cast %53 : i32 to index
    %c0_37 = arith.constant 0 : index
    %55 = vector.load %arg2[%c0_36, %54, %c0_37] : memref<1x324x4xf32, #tpu.memory_space<vmem>>, vector<1x16x4xf32>
    %56 = vector.shape_cast %55 : vector<1x16x4xf32> to vector<16x4xf32>
    %c18_i32_38 = arith.constant 18 : i32
    %57 = arith.addi %0, %c18_i32_38 : i32
    %c2_i32_39 = arith.constant 2 : i32
    %58 = arith.addi %57, %c2_i32_39 : i32
    %c0_40 = arith.constant 0 : index
    %59 = arith.index_cast %58 : i32 to index
    %c0_41 = arith.constant 0 : index
    %60 = vector.load %arg2[%c0_40, %59, %c0_41] : memref<1x324x4xf32, #tpu.memory_space<vmem>>, vector<1x16x4xf32>
    %61 = vector.shape_cast %60 : vector<1x16x4xf32> to vector<16x4xf32>
    %c36_i32_42 = arith.constant 36 : i32
    %62 = arith.addi %0, %c36_i32_42 : i32
    %c0_i32_43 = arith.constant 0 : i32
    %63 = arith.addi %62, %c0_i32_43 : i32
    %c0_44 = arith.constant 0 : index
    %64 = arith.index_cast %63 : i32 to index
    %c0_45 = arith.constant 0 : index
    %65 = vector.load %arg2[%c0_44, %64, %c0_45] : memref<1x324x4xf32, #tpu.memory_space<vmem>>, vector<1x16x4xf32>
    %66 = vector.shape_cast %65 : vector<1x16x4xf32> to vector<16x4xf32>
    %c36_i32_46 = arith.constant 36 : i32
    %67 = arith.addi %0, %c36_i32_46 : i32
    %c1_i32_47 = arith.constant 1 : i32
    %68 = arith.addi %67, %c1_i32_47 : i32
    %c0_48 = arith.constant 0 : index
    %69 = arith.index_cast %68 : i32 to index
    %c0_49 = arith.constant 0 : index
    %70 = vector.load %arg2[%c0_48, %69, %c0_49] : memref<1x324x4xf32, #tpu.memory_space<vmem>>, vector<1x16x4xf32>
    %71 = vector.shape_cast %70 : vector<1x16x4xf32> to vector<16x4xf32>
    %c36_i32_50 = arith.constant 36 : i32
    %72 = arith.addi %0, %c36_i32_50 : i32
    %c2_i32_51 = arith.constant 2 : i32
    %73 = arith.addi %72, %c2_i32_51 : i32
    %c0_52 = arith.constant 0 : index
    %74 = arith.index_cast %73 : i32 to index
    %c0_53 = arith.constant 0 : index
    %75 = vector.load %arg2[%c0_52, %74, %c0_53] : memref<1x324x4xf32, #tpu.memory_space<vmem>>, vector<1x16x4xf32>
    %76 = vector.shape_cast %75 : vector<1x16x4xf32> to vector<16x4xf32>
    %c54_i32 = arith.constant 54 : i32
    %77 = arith.addi %0, %c54_i32 : i32
    %c0_i32_54 = arith.constant 0 : i32
    %78 = arith.addi %77, %c0_i32_54 : i32
    %c0_55 = arith.constant 0 : index
    %79 = arith.index_cast %78 : i32 to index
    %c0_56 = arith.constant 0 : index
    %80 = vector.load %arg2[%c0_55, %79, %c0_56] : memref<1x324x4xf32, #tpu.memory_space<vmem>>, vector<1x16x4xf32>
    %81 = vector.shape_cast %80 : vector<1x16x4xf32> to vector<16x4xf32>
    %c54_i32_57 = arith.constant 54 : i32
    %82 = arith.addi %0, %c54_i32_57 : i32
    %c1_i32_58 = arith.constant 1 : i32
    %83 = arith.addi %82, %c1_i32_58 : i32
    %c0_59 = arith.constant 0 : index
    %84 = arith.index_cast %83 : i32 to index
    %c0_60 = arith.constant 0 : index
    %85 = vector.load %arg2[%c0_59, %84, %c0_60] : memref<1x324x4xf32, #tpu.memory_space<vmem>>, vector<1x16x4xf32>
    %86 = vector.shape_cast %85 : vector<1x16x4xf32> to vector<16x4xf32>
    %c54_i32_61 = arith.constant 54 : i32
    %87 = arith.addi %0, %c54_i32_61 : i32
    %c2_i32_62 = arith.constant 2 : i32
    %88 = arith.addi %87, %c2_i32_62 : i32
    %c0_63 = arith.constant 0 : index
    %89 = arith.index_cast %88 : i32 to index
    %c0_64 = arith.constant 0 : index
    %90 = vector.load %arg2[%c0_63, %89, %c0_64] : memref<1x324x4xf32, #tpu.memory_space<vmem>>, vector<1x16x4xf32>
    %91 = vector.shape_cast %90 : vector<1x16x4xf32> to vector<16x4xf32>
    %92 = tpu.concatenate %51, %56, %61, %66, %71, %76, %81, %86, %91 in 1 : vector<16x4xf32>, vector<16x4xf32>, vector<16x4xf32>, vector<16x4xf32>, vector<16x4xf32>, vector<16x4xf32>, vector<16x4xf32>, vector<16x4xf32>, vector<16x4xf32> -> vector<16x36xf32>
    %c36_i32_65 = arith.constant 36 : i32
    %93 = arith.addi %0, %c36_i32_65 : i32
    %c0_i32_66 = arith.constant 0 : i32
    %94 = arith.addi %93, %c0_i32_66 : i32
    %c0_67 = arith.constant 0 : index
    %95 = arith.index_cast %94 : i32 to index
    %c0_68 = arith.constant 0 : index
    %96 = vector.load %arg2[%c0_67, %95, %c0_68] : memref<1x324x4xf32, #tpu.memory_space<vmem>>, vector<1x16x4xf32>
    %97 = vector.shape_cast %96 : vector<1x16x4xf32> to vector<16x4xf32>
    %c36_i32_69 = arith.constant 36 : i32
    %98 = arith.addi %0, %c36_i32_69 : i32
    %c1_i32_70 = arith.constant 1 : i32
    %99 = arith.addi %98, %c1_i32_70 : i32
    %c0_71 = arith.constant 0 : index
    %100 = arith.index_cast %99 : i32 to index
    %c0_72 = arith.constant 0 : index
    %101 = vector.load %arg2[%c0_71, %100, %c0_72] : memref<1x324x4xf32, #tpu.memory_space<vmem>>, vector<1x16x4xf32>
    %102 = vector.shape_cast %101 : vector<1x16x4xf32> to vector<16x4xf32>
    %c36_i32_73 = arith.constant 36 : i32
    %103 = arith.addi %0, %c36_i32_73 : i32
    %c2_i32_74 = arith.constant 2 : i32
    %104 = arith.addi %103, %c2_i32_74 : i32
    %c0_75 = arith.constant 0 : index
    %105 = arith.index_cast %104 : i32 to index
    %c0_76 = arith.constant 0 : index
    %106 = vector.load %arg2[%c0_75, %105, %c0_76] : memref<1x324x4xf32, #tpu.memory_space<vmem>>, vector<1x16x4xf32>
    %107 = vector.shape_cast %106 : vector<1x16x4xf32> to vector<16x4xf32>
    %c54_i32_77 = arith.constant 54 : i32
    %108 = arith.addi %0, %c54_i32_77 : i32
    %c0_i32_78 = arith.constant 0 : i32
    %109 = arith.addi %108, %c0_i32_78 : i32
    %c0_79 = arith.constant 0 : index
    %110 = arith.index_cast %109 : i32 to index
    %c0_80 = arith.constant 0 : index
    %111 = vector.load %arg2[%c0_79, %110, %c0_80] : memref<1x324x4xf32, #tpu.memory_space<vmem>>, vector<1x16x4xf32>
    %112 = vector.shape_cast %111 : vector<1x16x4xf32> to vector<16x4xf32>
    %c54_i32_81 = arith.constant 54 : i32
    %113 = arith.addi %0, %c54_i32_81 : i32
    %c1_i32_82 = arith.constant 1 : i32
    %114 = arith.addi %113, %c1_i32_82 : i32
    %c0_83 = arith.constant 0 : index
    %115 = arith.index_cast %114 : i32 to index
    %c0_84 = arith.constant 0 : index
    %116 = vector.load %arg2[%c0_83, %115, %c0_84] : memref<1x324x4xf32, #tpu.memory_space<vmem>>, vector<1x16x4xf32>
    %117 = vector.shape_cast %116 : vector<1x16x4xf32> to vector<16x4xf32>
    %c54_i32_85 = arith.constant 54 : i32
    %118 = arith.addi %0, %c54_i32_85 : i32
    %c2_i32_86 = arith.constant 2 : i32
    %119 = arith.addi %118, %c2_i32_86 : i32
    %c0_87 = arith.constant 0 : index
    %120 = arith.index_cast %119 : i32 to index
    %c0_88 = arith.constant 0 : index
    %121 = vector.load %arg2[%c0_87, %120, %c0_88] : memref<1x324x4xf32, #tpu.memory_space<vmem>>, vector<1x16x4xf32>
    %122 = vector.shape_cast %121 : vector<1x16x4xf32> to vector<16x4xf32>
    %c72_i32 = arith.constant 72 : i32
    %123 = arith.addi %0, %c72_i32 : i32
    %c0_i32_89 = arith.constant 0 : i32
    %124 = arith.addi %123, %c0_i32_89 : i32
    %c0_90 = arith.constant 0 : index
    %125 = arith.index_cast %124 : i32 to index
    %c0_91 = arith.constant 0 : index
    %126 = vector.load %arg2[%c0_90, %125, %c0_91] : memref<1x324x4xf32, #tpu.memory_space<vmem>>, vector<1x16x4xf32>
    %127 = vector.shape_cast %126 : vector<1x16x4xf32> to vector<16x4xf32>
    %c72_i32_92 = arith.constant 72 : i32
    %128 = arith.addi %0, %c72_i32_92 : i32
    %c1_i32_93 = arith.constant 1 : i32
    %129 = arith.addi %128, %c1_i32_93 : i32
    %c0_94 = arith.constant 0 : index
    %130 = arith.index_cast %129 : i32 to index
    %c0_95 = arith.constant 0 : index
    %131 = vector.load %arg2[%c0_94, %130, %c0_95] : memref<1x324x4xf32, #tpu.memory_space<vmem>>, vector<1x16x4xf32>
    %132 = vector.shape_cast %131 : vector<1x16x4xf32> to vector<16x4xf32>
    %c72_i32_96 = arith.constant 72 : i32
    %133 = arith.addi %0, %c72_i32_96 : i32
    %c2_i32_97 = arith.constant 2 : i32
    %134 = arith.addi %133, %c2_i32_97 : i32
    %c0_98 = arith.constant 0 : index
    %135 = arith.index_cast %134 : i32 to index
    %c0_99 = arith.constant 0 : index
    %136 = vector.load %arg2[%c0_98, %135, %c0_99] : memref<1x324x4xf32, #tpu.memory_space<vmem>>, vector<1x16x4xf32>
    %137 = vector.shape_cast %136 : vector<1x16x4xf32> to vector<16x4xf32>
    %138 = tpu.concatenate %97, %102, %107, %112, %117, %122, %127, %132, %137 in 1 : vector<16x4xf32>, vector<16x4xf32>, vector<16x4xf32>, vector<16x4xf32>, vector<16x4xf32>, vector<16x4xf32>, vector<16x4xf32>, vector<16x4xf32>, vector<16x4xf32> -> vector<16x36xf32>
    %c54_i32_100 = arith.constant 54 : i32
    %139 = arith.addi %0, %c54_i32_100 : i32
    %c0_i32_101 = arith.constant 0 : i32
    %140 = arith.addi %139, %c0_i32_101 : i32
    %c0_102 = arith.constant 0 : index
    %141 = arith.index_cast %140 : i32 to index
    %c0_103 = arith.constant 0 : index
    %142 = vector.load %arg2[%c0_102, %141, %c0_103] : memref<1x324x4xf32, #tpu.memory_space<vmem>>, vector<1x16x4xf32>
    %143 = vector.shape_cast %142 : vector<1x16x4xf32> to vector<16x4xf32>
    %c54_i32_104 = arith.constant 54 : i32
    %144 = arith.addi %0, %c54_i32_104 : i32
    %c1_i32_105 = arith.constant 1 : i32
    %145 = arith.addi %144, %c1_i32_105 : i32
    %c0_106 = arith.constant 0 : index
    %146 = arith.index_cast %145 : i32 to index
    %c0_107 = arith.constant 0 : index
    %147 = vector.load %arg2[%c0_106, %146, %c0_107] : memref<1x324x4xf32, #tpu.memory_space<vmem>>, vector<1x16x4xf32>
    %148 = vector.shape_cast %147 : vector<1x16x4xf32> to vector<16x4xf32>
    %c54_i32_108 = arith.constant 54 : i32
    %149 = arith.addi %0, %c54_i32_108 : i32
    %c2_i32_109 = arith.constant 2 : i32
    %150 = arith.addi %149, %c2_i32_109 : i32
    %c0_110 = arith.constant 0 : index
    %151 = arith.index_cast %150 : i32 to index
    %c0_111 = arith.constant 0 : index
    %152 = vector.load %arg2[%c0_110, %151, %c0_111] : memref<1x324x4xf32, #tpu.memory_space<vmem>>, vector<1x16x4xf32>
    %153 = vector.shape_cast %152 : vector<1x16x4xf32> to vector<16x4xf32>
    %c72_i32_112 = arith.constant 72 : i32
    %154 = arith.addi %0, %c72_i32_112 : i32
    %c0_i32_113 = arith.constant 0 : i32
    %155 = arith.addi %154, %c0_i32_113 : i32
    %c0_114 = arith.constant 0 : index
    %156 = arith.index_cast %155 : i32 to index
    %c0_115 = arith.constant 0 : index
    %157 = vector.load %arg2[%c0_114, %156, %c0_115] : memref<1x324x4xf32, #tpu.memory_space<vmem>>, vector<1x16x4xf32>
    %158 = vector.shape_cast %157 : vector<1x16x4xf32> to vector<16x4xf32>
    %c72_i32_116 = arith.constant 72 : i32
    %159 = arith.addi %0, %c72_i32_116 : i32
    %c1_i32_117 = arith.constant 1 : i32
    %160 = arith.addi %159, %c1_i32_117 : i32
    %c0_118 = arith.constant 0 : index
    %161 = arith.index_cast %160 : i32 to index
    %c0_119 = arith.constant 0 : index
    %162 = vector.load %arg2[%c0_118, %161, %c0_119] : memref<1x324x4xf32, #tpu.memory_space<vmem>>, vector<1x16x4xf32>
    %163 = vector.shape_cast %162 : vector<1x16x4xf32> to vector<16x4xf32>
    %c72_i32_120 = arith.constant 72 : i32
    %164 = arith.addi %0, %c72_i32_120 : i32
    %c2_i32_121 = arith.constant 2 : i32
    %165 = arith.addi %164, %c2_i32_121 : i32
    %c0_122 = arith.constant 0 : index
    %166 = arith.index_cast %165 : i32 to index
    %c0_123 = arith.constant 0 : index
    %167 = vector.load %arg2[%c0_122, %166, %c0_123] : memref<1x324x4xf32, #tpu.memory_space<vmem>>, vector<1x16x4xf32>
    %168 = vector.shape_cast %167 : vector<1x16x4xf32> to vector<16x4xf32>
    %c90_i32 = arith.constant 90 : i32
    %169 = arith.addi %0, %c90_i32 : i32
    %c0_i32_124 = arith.constant 0 : i32
    %170 = arith.addi %169, %c0_i32_124 : i32
    %c0_125 = arith.constant 0 : index
    %171 = arith.index_cast %170 : i32 to index
    %c0_126 = arith.constant 0 : index
    %172 = vector.load %arg2[%c0_125, %171, %c0_126] : memref<1x324x4xf32, #tpu.memory_space<vmem>>, vector<1x16x4xf32>
    %173 = vector.shape_cast %172 : vector<1x16x4xf32> to vector<16x4xf32>
    %c90_i32_127 = arith.constant 90 : i32
    %174 = arith.addi %0, %c90_i32_127 : i32
    %c1_i32_128 = arith.constant 1 : i32
    %175 = arith.addi %174, %c1_i32_128 : i32
    %c0_129 = arith.constant 0 : index
    %176 = arith.index_cast %175 : i32 to index
    %c0_130 = arith.constant 0 : index
    %177 = vector.load %arg2[%c0_129, %176, %c0_130] : memref<1x324x4xf32, #tpu.memory_space<vmem>>, vector<1x16x4xf32>
    %178 = vector.shape_cast %177 : vector<1x16x4xf32> to vector<16x4xf32>
    %c90_i32_131 = arith.constant 90 : i32
    %179 = arith.addi %0, %c90_i32_131 : i32
    %c2_i32_132 = arith.constant 2 : i32
    %180 = arith.addi %179, %c2_i32_132 : i32
    %c0_133 = arith.constant 0 : index
    %181 = arith.index_cast %180 : i32 to index
    %c0_134 = arith.constant 0 : index
    %182 = vector.load %arg2[%c0_133, %181, %c0_134] : memref<1x324x4xf32, #tpu.memory_space<vmem>>, vector<1x16x4xf32>
    %183 = vector.shape_cast %182 : vector<1x16x4xf32> to vector<16x4xf32>
    %184 = tpu.concatenate %143, %148, %153, %158, %163, %168, %173, %178, %183 in 1 : vector<16x4xf32>, vector<16x4xf32>, vector<16x4xf32>, vector<16x4xf32>, vector<16x4xf32>, vector<16x4xf32>, vector<16x4xf32>, vector<16x4xf32>, vector<16x4xf32> -> vector<16x36xf32>
    %c72_i32_135 = arith.constant 72 : i32
    %185 = arith.addi %0, %c72_i32_135 : i32
    %c0_i32_136 = arith.constant 0 : i32
    %186 = arith.addi %185, %c0_i32_136 : i32
    %c0_137 = arith.constant 0 : index
    %187 = arith.index_cast %186 : i32 to index
    %c0_138 = arith.constant 0 : index
    %188 = vector.load %arg2[%c0_137, %187, %c0_138] : memref<1x324x4xf32, #tpu.memory_space<vmem>>, vector<1x16x4xf32>
    %189 = vector.shape_cast %188 : vector<1x16x4xf32> to vector<16x4xf32>
    %c72_i32_139 = arith.constant 72 : i32
    %190 = arith.addi %0, %c72_i32_139 : i32
    %c1_i32_140 = arith.constant 1 : i32
    %191 = arith.addi %190, %c1_i32_140 : i32
    %c0_141 = arith.constant 0 : index
    %192 = arith.index_cast %191 : i32 to index
    %c0_142 = arith.constant 0 : index
    %193 = vector.load %arg2[%c0_141, %192, %c0_142] : memref<1x324x4xf32, #tpu.memory_space<vmem>>, vector<1x16x4xf32>
    %194 = vector.shape_cast %193 : vector<1x16x4xf32> to vector<16x4xf32>
    %c72_i32_143 = arith.constant 72 : i32
    %195 = arith.addi %0, %c72_i32_143 : i32
    %c2_i32_144 = arith.constant 2 : i32
    %196 = arith.addi %195, %c2_i32_144 : i32
    %c0_145 = arith.constant 0 : index
    %197 = arith.index_cast %196 : i32 to index
    %c0_146 = arith.constant 0 : index
    %198 = vector.load %arg2[%c0_145, %197, %c0_146] : memref<1x324x4xf32, #tpu.memory_space<vmem>>, vector<1x16x4xf32>
    %199 = vector.shape_cast %198 : vector<1x16x4xf32> to vector<16x4xf32>
    %c90_i32_147 = arith.constant 90 : i32
    %200 = arith.addi %0, %c90_i32_147 : i32
    %c0_i32_148 = arith.constant 0 : i32
    %201 = arith.addi %200, %c0_i32_148 : i32
    %c0_149 = arith.constant 0 : index
    %202 = arith.index_cast %201 : i32 to index
    %c0_150 = arith.constant 0 : index
    %203 = vector.load %arg2[%c0_149, %202, %c0_150] : memref<1x324x4xf32, #tpu.memory_space<vmem>>, vector<1x16x4xf32>
    %204 = vector.shape_cast %203 : vector<1x16x4xf32> to vector<16x4xf32>
    %c90_i32_151 = arith.constant 90 : i32
    %205 = arith.addi %0, %c90_i32_151 : i32
    %c1_i32_152 = arith.constant 1 : i32
    %206 = arith.addi %205, %c1_i32_152 : i32
    %c0_153 = arith.constant 0 : index
    %207 = arith.index_cast %206 : i32 to index
    %c0_154 = arith.constant 0 : index
    %208 = vector.load %arg2[%c0_153, %207, %c0_154] : memref<1x324x4xf32, #tpu.memory_space<vmem>>, vector<1x16x4xf32>
    %209 = vector.shape_cast %208 : vector<1x16x4xf32> to vector<16x4xf32>
    %c90_i32_155 = arith.constant 90 : i32
    %210 = arith.addi %0, %c90_i32_155 : i32
    %c2_i32_156 = arith.constant 2 : i32
    %211 = arith.addi %210, %c2_i32_156 : i32
    %c0_157 = arith.constant 0 : index
    %212 = arith.index_cast %211 : i32 to index
    %c0_158 = arith.constant 0 : index
    %213 = vector.load %arg2[%c0_157, %212, %c0_158] : memref<1x324x4xf32, #tpu.memory_space<vmem>>, vector<1x16x4xf32>
    %214 = vector.shape_cast %213 : vector<1x16x4xf32> to vector<16x4xf32>
    %c108_i32 = arith.constant 108 : i32
    %215 = arith.addi %0, %c108_i32 : i32
    %c0_i32_159 = arith.constant 0 : i32
    %216 = arith.addi %215, %c0_i32_159 : i32
    %c0_160 = arith.constant 0 : index
    %217 = arith.index_cast %216 : i32 to index
    %c0_161 = arith.constant 0 : index
    %218 = vector.load %arg2[%c0_160, %217, %c0_161] : memref<1x324x4xf32, #tpu.memory_space<vmem>>, vector<1x16x4xf32>
    %219 = vector.shape_cast %218 : vector<1x16x4xf32> to vector<16x4xf32>
    %c108_i32_162 = arith.constant 108 : i32
    %220 = arith.addi %0, %c108_i32_162 : i32
    %c1_i32_163 = arith.constant 1 : i32
    %221 = arith.addi %220, %c1_i32_163 : i32
    %c0_164 = arith.constant 0 : index
    %222 = arith.index_cast %221 : i32 to index
    %c0_165 = arith.constant 0 : index
    %223 = vector.load %arg2[%c0_164, %222, %c0_165] : memref<1x324x4xf32, #tpu.memory_space<vmem>>, vector<1x16x4xf32>
    %224 = vector.shape_cast %223 : vector<1x16x4xf32> to vector<16x4xf32>
    %c108_i32_166 = arith.constant 108 : i32
    %225 = arith.addi %0, %c108_i32_166 : i32
    %c2_i32_167 = arith.constant 2 : i32
    %226 = arith.addi %225, %c2_i32_167 : i32
    %c0_168 = arith.constant 0 : index
    %227 = arith.index_cast %226 : i32 to index
    %c0_169 = arith.constant 0 : index
    %228 = vector.load %arg2[%c0_168, %227, %c0_169] : memref<1x324x4xf32, #tpu.memory_space<vmem>>, vector<1x16x4xf32>
    %229 = vector.shape_cast %228 : vector<1x16x4xf32> to vector<16x4xf32>
    %230 = tpu.concatenate %189, %194, %199, %204, %209, %214, %219, %224, %229 in 1 : vector<16x4xf32>, vector<16x4xf32>, vector<16x4xf32>, vector<16x4xf32>, vector<16x4xf32>, vector<16x4xf32>, vector<16x4xf32>, vector<16x4xf32>, vector<16x4xf32> -> vector<16x36xf32>
    %c90_i32_170 = arith.constant 90 : i32
    %231 = arith.addi %0, %c90_i32_170 : i32
    %c0_i32_171 = arith.constant 0 : i32
    %232 = arith.addi %231, %c0_i32_171 : i32
    %c0_172 = arith.constant 0 : index
    %233 = arith.index_cast %232 : i32 to index
    %c0_173 = arith.constant 0 : index
    %234 = vector.load %arg2[%c0_172, %233, %c0_173] : memref<1x324x4xf32, #tpu.memory_space<vmem>>, vector<1x16x4xf32>
    %235 = vector.shape_cast %234 : vector<1x16x4xf32> to vector<16x4xf32>
    %c90_i32_174 = arith.constant 90 : i32
    %236 = arith.addi %0, %c90_i32_174 : i32
    %c1_i32_175 = arith.constant 1 : i32
    %237 = arith.addi %236, %c1_i32_175 : i32
    %c0_176 = arith.constant 0 : index
    %238 = arith.index_cast %237 : i32 to index
    %c0_177 = arith.constant 0 : index
    %239 = vector.load %arg2[%c0_176, %238, %c0_177] : memref<1x324x4xf32, #tpu.memory_space<vmem>>, vector<1x16x4xf32>
    %240 = vector.shape_cast %239 : vector<1x16x4xf32> to vector<16x4xf32>
    %c90_i32_178 = arith.constant 90 : i32
    %241 = arith.addi %0, %c90_i32_178 : i32
    %c2_i32_179 = arith.constant 2 : i32
    %242 = arith.addi %241, %c2_i32_179 : i32
    %c0_180 = arith.constant 0 : index
    %243 = arith.index_cast %242 : i32 to index
    %c0_181 = arith.constant 0 : index
    %244 = vector.load %arg2[%c0_180, %243, %c0_181] : memref<1x324x4xf32, #tpu.memory_space<vmem>>, vector<1x16x4xf32>
    %245 = vector.shape_cast %244 : vector<1x16x4xf32> to vector<16x4xf32>
    %c108_i32_182 = arith.constant 108 : i32
    %246 = arith.addi %0, %c108_i32_182 : i32
    %c0_i32_183 = arith.constant 0 : i32
    %247 = arith.addi %246, %c0_i32_183 : i32
    %c0_184 = arith.constant 0 : index
    %248 = arith.index_cast %247 : i32 to index
    %c0_185 = arith.constant 0 : index
    %249 = vector.load %arg2[%c0_184, %248, %c0_185] : memref<1x324x4xf32, #tpu.memory_space<vmem>>, vector<1x16x4xf32>
    %250 = vector.shape_cast %249 : vector<1x16x4xf32> to vector<16x4xf32>
    %c108_i32_186 = arith.constant 108 : i32
    %251 = arith.addi %0, %c108_i32_186 : i32
    %c1_i32_187 = arith.constant 1 : i32
    %252 = arith.addi %251, %c1_i32_187 : i32
    %c0_188 = arith.constant 0 : index
    %253 = arith.index_cast %252 : i32 to index
    %c0_189 = arith.constant 0 : index
    %254 = vector.load %arg2[%c0_188, %253, %c0_189] : memref<1x324x4xf32, #tpu.memory_space<vmem>>, vector<1x16x4xf32>
    %255 = vector.shape_cast %254 : vector<1x16x4xf32> to vector<16x4xf32>
    %c108_i32_190 = arith.constant 108 : i32
    %256 = arith.addi %0, %c108_i32_190 : i32
    %c2_i32_191 = arith.constant 2 : i32
    %257 = arith.addi %256, %c2_i32_191 : i32
    %c0_192 = arith.constant 0 : index
    %258 = arith.index_cast %257 : i32 to index
    %c0_193 = arith.constant 0 : index
    %259 = vector.load %arg2[%c0_192, %258, %c0_193] : memref<1x324x4xf32, #tpu.memory_space<vmem>>, vector<1x16x4xf32>
    %260 = vector.shape_cast %259 : vector<1x16x4xf32> to vector<16x4xf32>
    %c126_i32 = arith.constant 126 : i32
    %261 = arith.addi %0, %c126_i32 : i32
    %c0_i32_194 = arith.constant 0 : i32
    %262 = arith.addi %261, %c0_i32_194 : i32
    %c0_195 = arith.constant 0 : index
    %263 = arith.index_cast %262 : i32 to index
    %c0_196 = arith.constant 0 : index
    %264 = vector.load %arg2[%c0_195, %263, %c0_196] : memref<1x324x4xf32, #tpu.memory_space<vmem>>, vector<1x16x4xf32>
    %265 = vector.shape_cast %264 : vector<1x16x4xf32> to vector<16x4xf32>
    %c126_i32_197 = arith.constant 126 : i32
    %266 = arith.addi %0, %c126_i32_197 : i32
    %c1_i32_198 = arith.constant 1 : i32
    %267 = arith.addi %266, %c1_i32_198 : i32
    %c0_199 = arith.constant 0 : index
    %268 = arith.index_cast %267 : i32 to index
    %c0_200 = arith.constant 0 : index
    %269 = vector.load %arg2[%c0_199, %268, %c0_200] : memref<1x324x4xf32, #tpu.memory_space<vmem>>, vector<1x16x4xf32>
    %270 = vector.shape_cast %269 : vector<1x16x4xf32> to vector<16x4xf32>
    %c126_i32_201 = arith.constant 126 : i32
    %271 = arith.addi %0, %c126_i32_201 : i32
    %c2_i32_202 = arith.constant 2 : i32
    %272 = arith.addi %271, %c2_i32_202 : i32
    %c0_203 = arith.constant 0 : index
    %273 = arith.index_cast %272 : i32 to index
    %c0_204 = arith.constant 0 : index
    %274 = vector.load %arg2[%c0_203, %273, %c0_204] : memref<1x324x4xf32, #tpu.memory_space<vmem>>, vector<1x16x4xf32>
    %275 = vector.shape_cast %274 : vector<1x16x4xf32> to vector<16x4xf32>
    %276 = tpu.concatenate %235, %240, %245, %250, %255, %260, %265, %270, %275 in 1 : vector<16x4xf32>, vector<16x4xf32>, vector<16x4xf32>, vector<16x4xf32>, vector<16x4xf32>, vector<16x4xf32>, vector<16x4xf32>, vector<16x4xf32>, vector<16x4xf32> -> vector<16x36xf32>
    %c108_i32_205 = arith.constant 108 : i32
    %277 = arith.addi %0, %c108_i32_205 : i32
    %c0_i32_206 = arith.constant 0 : i32
    %278 = arith.addi %277, %c0_i32_206 : i32
    %c0_207 = arith.constant 0 : index
    %279 = arith.index_cast %278 : i32 to index
    %c0_208 = arith.constant 0 : index
    %280 = vector.load %arg2[%c0_207, %279, %c0_208] : memref<1x324x4xf32, #tpu.memory_space<vmem>>, vector<1x16x4xf32>
    %281 = vector.shape_cast %280 : vector<1x16x4xf32> to vector<16x4xf32>
    %c108_i32_209 = arith.constant 108 : i32
    %282 = arith.addi %0, %c108_i32_209 : i32
    %c1_i32_210 = arith.constant 1 : i32
    %283 = arith.addi %282, %c1_i32_210 : i32
    %c0_211 = arith.constant 0 : index
    %284 = arith.index_cast %283 : i32 to index
    %c0_212 = arith.constant 0 : index
    %285 = vector.load %arg2[%c0_211, %284, %c0_212] : memref<1x324x4xf32, #tpu.memory_space<vmem>>, vector<1x16x4xf32>
    %286 = vector.shape_cast %285 : vector<1x16x4xf32> to vector<16x4xf32>
    %c108_i32_213 = arith.constant 108 : i32
    %287 = arith.addi %0, %c108_i32_213 : i32
    %c2_i32_214 = arith.constant 2 : i32
    %288 = arith.addi %287, %c2_i32_214 : i32
    %c0_215 = arith.constant 0 : index
    %289 = arith.index_cast %288 : i32 to index
    %c0_216 = arith.constant 0 : index
    %290 = vector.load %arg2[%c0_215, %289, %c0_216] : memref<1x324x4xf32, #tpu.memory_space<vmem>>, vector<1x16x4xf32>
    %291 = vector.shape_cast %290 : vector<1x16x4xf32> to vector<16x4xf32>
    %c126_i32_217 = arith.constant 126 : i32
    %292 = arith.addi %0, %c126_i32_217 : i32
    %c0_i32_218 = arith.constant 0 : i32
    %293 = arith.addi %292, %c0_i32_218 : i32
    %c0_219 = arith.constant 0 : index
    %294 = arith.index_cast %293 : i32 to index
    %c0_220 = arith.constant 0 : index
    %295 = vector.load %arg2[%c0_219, %294, %c0_220] : memref<1x324x4xf32, #tpu.memory_space<vmem>>, vector<1x16x4xf32>
    %296 = vector.shape_cast %295 : vector<1x16x4xf32> to vector<16x4xf32>
    %c126_i32_221 = arith.constant 126 : i32
    %297 = arith.addi %0, %c126_i32_221 : i32
    %c1_i32_222 = arith.constant 1 : i32
    %298 = arith.addi %297, %c1_i32_222 : i32
    %c0_223 = arith.constant 0 : index
    %299 = arith.index_cast %298 : i32 to index
    %c0_224 = arith.constant 0 : index
    %300 = vector.load %arg2[%c0_223, %299, %c0_224] : memref<1x324x4xf32, #tpu.memory_space<vmem>>, vector<1x16x4xf32>
    %301 = vector.shape_cast %300 : vector<1x16x4xf32> to vector<16x4xf32>
    %c126_i32_225 = arith.constant 126 : i32
    %302 = arith.addi %0, %c126_i32_225 : i32
    %c2_i32_226 = arith.constant 2 : i32
    %303 = arith.addi %302, %c2_i32_226 : i32
    %c0_227 = arith.constant 0 : index
    %304 = arith.index_cast %303 : i32 to index
    %c0_228 = arith.constant 0 : index
    %305 = vector.load %arg2[%c0_227, %304, %c0_228] : memref<1x324x4xf32, #tpu.memory_space<vmem>>, vector<1x16x4xf32>
    %306 = vector.shape_cast %305 : vector<1x16x4xf32> to vector<16x4xf32>
    %c144_i32_229 = arith.constant 144 : i32
    %307 = arith.addi %0, %c144_i32_229 : i32
    %c0_i32_230 = arith.constant 0 : i32
    %308 = arith.addi %307, %c0_i32_230 : i32
    %c0_231 = arith.constant 0 : index
    %309 = arith.index_cast %308 : i32 to index
    %c0_232 = arith.constant 0 : index
    %310 = vector.load %arg2[%c0_231, %309, %c0_232] : memref<1x324x4xf32, #tpu.memory_space<vmem>>, vector<1x16x4xf32>
    %311 = vector.shape_cast %310 : vector<1x16x4xf32> to vector<16x4xf32>
    %c144_i32_233 = arith.constant 144 : i32
    %312 = arith.addi %0, %c144_i32_233 : i32
    %c1_i32_234 = arith.constant 1 : i32
    %313 = arith.addi %312, %c1_i32_234 : i32
    %c0_235 = arith.constant 0 : index
    %314 = arith.index_cast %313 : i32 to index
    %c0_236 = arith.constant 0 : index
    %315 = vector.load %arg2[%c0_235, %314, %c0_236] : memref<1x324x4xf32, #tpu.memory_space<vmem>>, vector<1x16x4xf32>
    %316 = vector.shape_cast %315 : vector<1x16x4xf32> to vector<16x4xf32>
    %c144_i32_237 = arith.constant 144 : i32
    %317 = arith.addi %0, %c144_i32_237 : i32
    %c2_i32_238 = arith.constant 2 : i32
    %318 = arith.addi %317, %c2_i32_238 : i32
    %c0_239 = arith.constant 0 : index
    %319 = arith.index_cast %318 : i32 to index
    %c0_240 = arith.constant 0 : index
    %320 = vector.load %arg2[%c0_239, %319, %c0_240] : memref<1x324x4xf32, #tpu.memory_space<vmem>>, vector<1x16x4xf32>
    %321 = vector.shape_cast %320 : vector<1x16x4xf32> to vector<16x4xf32>
    %322 = tpu.concatenate %281, %286, %291, %296, %301, %306, %311, %316, %321 in 1 : vector<16x4xf32>, vector<16x4xf32>, vector<16x4xf32>, vector<16x4xf32>, vector<16x4xf32>, vector<16x4xf32>, vector<16x4xf32>, vector<16x4xf32>, vector<16x4xf32> -> vector<16x36xf32>
    %c126_i32_241 = arith.constant 126 : i32
    %323 = arith.addi %0, %c126_i32_241 : i32
    %c0_i32_242 = arith.constant 0 : i32
    %324 = arith.addi %323, %c0_i32_242 : i32
    %c0_243 = arith.constant 0 : index
    %325 = arith.index_cast %324 : i32 to index
    %c0_244 = arith.constant 0 : index
    %326 = vector.load %arg2[%c0_243, %325, %c0_244] : memref<1x324x4xf32, #tpu.memory_space<vmem>>, vector<1x16x4xf32>
    %327 = vector.shape_cast %326 : vector<1x16x4xf32> to vector<16x4xf32>
    %c126_i32_245 = arith.constant 126 : i32
    %328 = arith.addi %0, %c126_i32_245 : i32
    %c1_i32_246 = arith.constant 1 : i32
    %329 = arith.addi %328, %c1_i32_246 : i32
    %c0_247 = arith.constant 0 : index
    %330 = arith.index_cast %329 : i32 to index
    %c0_248 = arith.constant 0 : index
    %331 = vector.load %arg2[%c0_247, %330, %c0_248] : memref<1x324x4xf32, #tpu.memory_space<vmem>>, vector<1x16x4xf32>
    %332 = vector.shape_cast %331 : vector<1x16x4xf32> to vector<16x4xf32>
    %c126_i32_249 = arith.constant 126 : i32
    %333 = arith.addi %0, %c126_i32_249 : i32
    %c2_i32_250 = arith.constant 2 : i32
    %334 = arith.addi %333, %c2_i32_250 : i32
    %c0_251 = arith.constant 0 : index
    %335 = arith.index_cast %334 : i32 to index
    %c0_252 = arith.constant 0 : index
    %336 = vector.load %arg2[%c0_251, %335, %c0_252] : memref<1x324x4xf32, #tpu.memory_space<vmem>>, vector<1x16x4xf32>
    %337 = vector.shape_cast %336 : vector<1x16x4xf32> to vector<16x4xf32>
    %c144_i32_253 = arith.constant 144 : i32
    %338 = arith.addi %0, %c144_i32_253 : i32
    %c0_i32_254 = arith.constant 0 : i32
    %339 = arith.addi %338, %c0_i32_254 : i32
    %c0_255 = arith.constant 0 : index
    %340 = arith.index_cast %339 : i32 to index
    %c0_256 = arith.constant 0 : index
    %341 = vector.load %arg2[%c0_255, %340, %c0_256] : memref<1x324x4xf32, #tpu.memory_space<vmem>>, vector<1x16x4xf32>
    %342 = vector.shape_cast %341 : vector<1x16x4xf32> to vector<16x4xf32>
    %c144_i32_257 = arith.constant 144 : i32
    %343 = arith.addi %0, %c144_i32_257 : i32
    %c1_i32_258 = arith.constant 1 : i32
    %344 = arith.addi %343, %c1_i32_258 : i32
    %c0_259 = arith.constant 0 : index
    %345 = arith.index_cast %344 : i32 to index
    %c0_260 = arith.constant 0 : index
    %346 = vector.load %arg2[%c0_259, %345, %c0_260] : memref<1x324x4xf32, #tpu.memory_space<vmem>>, vector<1x16x4xf32>
    %347 = vector.shape_cast %346 : vector<1x16x4xf32> to vector<16x4xf32>
    %c144_i32_261 = arith.constant 144 : i32
    %348 = arith.addi %0, %c144_i32_261 : i32
    %c2_i32_262 = arith.constant 2 : i32
    %349 = arith.addi %348, %c2_i32_262 : i32
    %c0_263 = arith.constant 0 : index
    %350 = arith.index_cast %349 : i32 to index
    %c0_264 = arith.constant 0 : index
    %351 = vector.load %arg2[%c0_263, %350, %c0_264] : memref<1x324x4xf32, #tpu.memory_space<vmem>>, vector<1x16x4xf32>
    %352 = vector.shape_cast %351 : vector<1x16x4xf32> to vector<16x4xf32>
    %c162_i32 = arith.constant 162 : i32
    %353 = arith.addi %0, %c162_i32 : i32
    %c0_i32_265 = arith.constant 0 : i32
    %354 = arith.addi %353, %c0_i32_265 : i32
    %c0_266 = arith.constant 0 : index
    %355 = arith.index_cast %354 : i32 to index
    %c0_267 = arith.constant 0 : index
    %356 = vector.load %arg2[%c0_266, %355, %c0_267] : memref<1x324x4xf32, #tpu.memory_space<vmem>>, vector<1x16x4xf32>
    %357 = vector.shape_cast %356 : vector<1x16x4xf32> to vector<16x4xf32>
    %c162_i32_268 = arith.constant 162 : i32
    %358 = arith.addi %0, %c162_i32_268 : i32
    %c1_i32_269 = arith.constant 1 : i32
    %359 = arith.addi %358, %c1_i32_269 : i32
    %c0_270 = arith.constant 0 : index
    %360 = arith.index_cast %359 : i32 to index
    %c0_271 = arith.constant 0 : index
    %361 = vector.load %arg2[%c0_270, %360, %c0_271] : memref<1x324x4xf32, #tpu.memory_space<vmem>>, vector<1x16x4xf32>
    %362 = vector.shape_cast %361 : vector<1x16x4xf32> to vector<16x4xf32>
    %c162_i32_272 = arith.constant 162 : i32
    %363 = arith.addi %0, %c162_i32_272 : i32
    %c2_i32_273 = arith.constant 2 : i32
    %364 = arith.addi %363, %c2_i32_273 : i32
    %c0_274 = arith.constant 0 : index
    %365 = arith.index_cast %364 : i32 to index
    %c0_275 = arith.constant 0 : index
    %366 = vector.load %arg2[%c0_274, %365, %c0_275] : memref<1x324x4xf32, #tpu.memory_space<vmem>>, vector<1x16x4xf32>
    %367 = vector.shape_cast %366 : vector<1x16x4xf32> to vector<16x4xf32>
    %368 = tpu.concatenate %327, %332, %337, %342, %347, %352, %357, %362, %367 in 1 : vector<16x4xf32>, vector<16x4xf32>, vector<16x4xf32>, vector<16x4xf32>, vector<16x4xf32>, vector<16x4xf32>, vector<16x4xf32>, vector<16x4xf32>, vector<16x4xf32> -> vector<16x36xf32>
    %369 = tpu.concatenate %46, %92, %138, %184, %230, %276, %322, %368 in 0 : vector<16x36xf32>, vector<16x36xf32>, vector<16x36xf32>, vector<16x36xf32>, vector<16x36xf32>, vector<16x36xf32>, vector<16x36xf32>, vector<16x36xf32> -> vector<128x36xf32>
    %c0_276 = arith.constant 0 : index
    %c0_277 = arith.constant 0 : index
    %370 = vector.load %arg3[%c0_276, %c0_277] : memref<36x128xf32, #tpu.memory_space<vmem>>, vector<36x128xf32>
    %cst = arith.constant dense<0.000000e+00> : vector<128x128xf32>
    %371 = tpu.matmul %369, %370, %cst {dimension_numbers = #tpu.dot_dimension_numbers<[1], [0], [0], [1], [0, 0, 1, 1], [], []>} : vector<128x36xf32>, vector<36x128xf32>, vector<128x128xf32> -> vector<128x128xf32>
    %cst_278 = arith.constant dense<0.000000e+00> : vector<128xf32>
    %372 = vector.multi_reduction <add>, %371, %cst_278 [0] : vector<128x128xf32> to vector<128xf32>
    %373 = vector.shape_cast %372 : vector<128xf32> to vector<1x128xf32>
    %374 = arith.mulf %371, %371 : vector<128x128xf32>
    %cst_279 = arith.constant dense<0.000000e+00> : vector<128xf32>
    %375 = vector.multi_reduction <add>, %374, %cst_279 [0] : vector<128x128xf32> to vector<128xf32>
    %376 = vector.shape_cast %375 : vector<128xf32> to vector<1x128xf32>
    %377 = tpu.concatenate %373, %376 in 0 : vector<1x128xf32>, vector<1x128xf32> -> vector<2x128xf32>
    %c0_280 = arith.constant 0 : index
    %c0_281 = arith.constant 0 : index
    %c0_282 = arith.constant 0 : index
    %c0_283 = arith.constant 0 : index
    %378 = vector.load %arg5[%c0_280, %c0_281, %c0_282, %c0_283] : memref<1x1x2x128xf32, #tpu.memory_space<vmem>>, vector<1x1x2x128xf32>
    %379 = vector.shape_cast %378 : vector<1x1x2x128xf32> to vector<2x128xf32>
    %380 = vector.shape_cast %377 : vector<2x128xf32> to vector<1x1x2x128xf32>
    tpu.vector_store %arg5[%c0_280, %c0_281, %c0_282, %c0_283], %380 {strides = array<i32>} : memref<1x1x2x128xf32, #tpu.memory_space<vmem>>, vector<1x1x2x128xf32>,
    %381 = tpu.transpose %371, [1, 0] : vector<128x128xf32> -> vector<128x128xf32>
    %382 = vector.extract_strided_slice %381 {offsets = [0, 0], sizes = [8, 128], strides = [1, 1]} : vector<128x128xf32> to vector<8x128xf32>
    %c0_284 = arith.constant 0 : index
    %c0_285 = arith.constant 0 : index
    %c0_286 = arith.constant 0 : index
    %383 = vector.load %arg4[%c0_284, %c0_285, %c0_286] : memref<1x8x128xf32, #tpu.memory_space<vmem>>, vector<1x8x128xf32>
    %384 = vector.shape_cast %383 : vector<1x8x128xf32> to vector<8x128xf32>
    %385 = vector.shape_cast %382 : vector<8x128xf32> to vector<1x8x128xf32>
    tpu.vector_store %arg4[%c0_284, %c0_285, %c0_286], %385 {strides = array<i32>} : memref<1x8x128xf32, #tpu.memory_space<vmem>>, vector<1x8x128xf32>,
    return
  }
  func.func @transform_0(%arg0: i32, %arg1: i32) -> (i32, i32, i32) {
    %c0_i32 = arith.constant 0 : i32
    %c0_i32_0 = arith.constant 0 : i32
    %c0_i32_1 = arith.constant 0 : i32
    return %arg0, %c0_i32, %c0_i32_0 : i32, i32, i32
  }
  func.func @transform_1(%arg0: i32, %arg1: i32) -> (i32, i32) {
    %c0_i32 = arith.constant 0 : i32
    %c0_i32_0 = arith.constant 0 : i32
    %c0_i32_1 = arith.constant 0 : i32
    return %c0_i32, %c0_i32_0 : i32, i32
  }
  func.func @transform_2(%arg0: i32, %arg1: i32) -> (i32, i32, i32) {
    %c0_i32 = arith.constant 0 : i32
    %c0_i32_0 = arith.constant 0 : i32
    return %arg0, %c0_i32, %arg1 : i32, i32, i32
  }
  func.func @transform_3(%arg0: i32, %arg1: i32) -> (i32, i32, i32, i32) {
    %c0_i32 = arith.constant 0 : i32
    %c0_i32_0 = arith.constant 0 : i32
    %c0_i32_1 = arith.constant 0 : i32
    return %arg0, %arg1, %c0_i32, %c0_i32_0 : i32, i32, i32, i32
  }
}

module attributes {stable_mosaic.version = 11 : i64} {
  func.func @_bn_apply_kernel(%arg0: i32, %arg1: i32, %arg2: memref<1x8x256xf32, #tpu.memory_space<vmem>>, %arg3: memref<8x1xf32, #tpu.memory_space<vmem>>, %arg4: memref<8x1xf32, #tpu.memory_space<vmem>>, %arg5: memref<1x8x256xf32, #tpu.memory_space<vmem>>) attributes {dimension_semantics = [#tpu.dimension_semantics<parallel>, #tpu.dimension_semantics<parallel>], iteration_bounds = array<i64: 2, 1>, scalar_prefetch = 0 : i64, scratch_operands = 0 : i64, tpu.core_type = #tpu.core_type<tc>, window_params = [{transform_indices = @transform_0, window_bounds = array<i64: 1, 8, 256>}, {pipeline_mode = #tpu.pipeline_mode<synchronous>, transform_indices = @transform_1, window_bounds = array<i64: 8, 1>}, {pipeline_mode = #tpu.pipeline_mode<synchronous>, transform_indices = @transform_2, window_bounds = array<i64: 8, 1>}, {transform_indices = @transform_3, window_bounds = array<i64: 1, 8, 256>}]} {
    %c0 = arith.constant 0 : index
    %c0_0 = arith.constant 0 : index
    %c0_1 = arith.constant 0 : index
    %0 = vector.load %arg2[%c0, %c0_0, %c0_1] : memref<1x8x256xf32, #tpu.memory_space<vmem>>, vector<1x8x256xf32>
    %c0_2 = arith.constant 0 : index
    %c0_3 = arith.constant 0 : index
    %1 = vector.load %arg3[%c0_2, %c0_3] : memref<8x1xf32, #tpu.memory_space<vmem>>, vector<8x1xf32>
    %2 = vector.shape_cast %1 : vector<8x1xf32> to vector<1x8x1xf32>
    %3 = vector.broadcast %2 : vector<1x8x1xf32> to vector<1x8x256xf32>
    %4 = arith.mulf %0, %3 : vector<1x8x256xf32>
    %c0_4 = arith.constant 0 : index
    %c0_5 = arith.constant 0 : index
    %5 = vector.load %arg4[%c0_4, %c0_5] : memref<8x1xf32, #tpu.memory_space<vmem>>, vector<8x1xf32>
    %6 = vector.shape_cast %5 : vector<8x1xf32> to vector<1x8x1xf32>
    %7 = vector.broadcast %6 : vector<1x8x1xf32> to vector<1x8x256xf32>
    %8 = arith.addf %4, %7 : vector<1x8x256xf32>
    %c0_6 = arith.constant 0 : index
    %c0_7 = arith.constant 0 : index
    %c0_8 = arith.constant 0 : index
    %9 = vector.load %arg5[%c0_6, %c0_7, %c0_8] : memref<1x8x256xf32, #tpu.memory_space<vmem>>, vector<1x8x256xf32>
    tpu.vector_store %arg5[%c0_6, %c0_7, %c0_8], %8 {strides = array<i32>} : memref<1x8x256xf32, #tpu.memory_space<vmem>>, vector<1x8x256xf32>,
    return
  }
  func.func @transform_0(%arg0: i32, %arg1: i32) -> (i32, i32, i32) {
    %c0_i32 = arith.constant 0 : i32
    %c0_i32_0 = arith.constant 0 : i32
    return %arg0, %c0_i32, %arg1 : i32, i32, i32
  }
  func.func @transform_1(%arg0: i32, %arg1: i32) -> (i32, i32) {
    %c0_i32 = arith.constant 0 : i32
    %c0_i32_0 = arith.constant 0 : i32
    %c0_i32_1 = arith.constant 0 : i32
    return %c0_i32, %c0_i32_0 : i32, i32
  }
  func.func @transform_2(%arg0: i32, %arg1: i32) -> (i32, i32) {
    %c0_i32 = arith.constant 0 : i32
    %c0_i32_0 = arith.constant 0 : i32
    %c0_i32_1 = arith.constant 0 : i32
    return %c0_i32, %c0_i32_0 : i32, i32
  }
  func.func @transform_3(%arg0: i32, %arg1: i32) -> (i32, i32, i32) {
    %c0_i32 = arith.constant 0 : i32
    %c0_i32_0 = arith.constant 0 : i32
    return %arg0, %c0_i32, %arg1 : i32, i32, i32
  }
}

</mosaic_0001>

<bundles_post_ra>
// kernel: conv_bn_forward.3
= control target key start
LH: loop header
LB: loop body
LE: loop exit
PB: predicated region body
PF: predicated region fallthrough
CT: control target
= control target key end

     0   :  { %s401_s12 = smov 0   ;;  %s403_s13 = smov 0   ;;  %s437_s0 = inlined_call_operand.vmem [shape: f32[2,8,256], index: 0, kind: input, shape index: {}]   ;;  %s438_s1 = inlined_call_operand.vmem [shape: f32[8,1], index: 1, kind: input, shape index: {}]   ;;  %s439_s2 = inlined_call_operand.vmem [shape: f32[8,1], index: 2, kind: input, shape index: {}]   ;;  %s440_s3 = inlined_call_operand.vmem [shape: f32[2,8,256], index: 3, kind: output, shape index: {}]  }
   0x1   :  { %s405_s14 = smov 0  }
   0x2 LB: > { %s25_s15 = sadd.s32 1, %s374_s13  ;;  %p321_p0 = scmp.ge.s32.totalorder %s378_s14, 1  ;;  %s378_s14 = sphi %s405_s14, %s13_s14   ;;  %s374_s13 = sphi %s403_s13, %s442_s13   ;;  %s370_s12 = sphi %s401_s12, %s441_s12  }
   0x3   : > { %p27_p1 = scmp.ge.s32.totalorder %s25_s15, 2  ;;  %p158_p2 = scmp.lt.s32.totalorder %s378_s14, 3 }
   0x5   : > { %s444_s15 = smov (%p27_p1, %s25_s15), 0  ;;  %p159_p3 = pnand %p321_p0, %p158_p2 }
   0x6   : > { %v212_v0 = vld [vmem:[%s438_s1] sm:$0xff] (!%p159_p3)  ;;  %v380_v1 = vmov (!%p159_p3), 0   ;;  %p191_p4 = scmp.lt.s32.totalorder (!%p159_p3), %s370_s12, 1 }
   0x7   : > { %162 = sbr.rel (%p159_p3) target bundleno = 143 (0x8f), region = 32  ;;  %355 = vset.pattern.permute.xlu0 (!%p159_p3), %v380_v1  ;;  %v220_v2 = vld [vmem:[%s439_s2] sm:$0xff] (!%p159_p3) }
   0x8   : > { %215 = vperm.xlu0 (!%p159_p3), %355, %v212_v0  }
   0xc   : > { %223 = vperm.xlu0 (!%p159_p3), %355, %v220_v2  }
   0xe   : > { %s446_s12 = smov (!%p191_p4, %s370_s12), 1 }
   0xf   : > { %s328_s20 = sshll.u32 %s446_s12, 4 }
  0x10   : > { %s198_s23 = scalar_lea.vmem %s437_s0, %s328_s20  ;;  %s208_s26 = scalar_lea.vmem %s440_s3, %s328_s20 }
  0x11   : > { %v210_v4 = vld [vmem:[%s198_s23] sm:$0xff]  ;;  %v211_v5 = vld [vmem:[%s198_s23 + $0x8] sm:$0xff] }
  0x87   : > { %v216_v3 = vpop.permute.xlu0 %215 }
  0x88   : > { %v218_v6 = vmul.f32 %v216_v3, %v210_v4  ;;  %v219_v7 = vmul.f32 %v216_v3, %v211_v5 }
  0x8b   : > { %v224_v8 = vpop.permute.xlu0 %223 }
  0x8c   : > { %v226_v9 = vadd.f32 %v224_v8, %v218_v6  ;;  %v227_v10 = vadd.f32 %v224_v8, %v219_v7 }
  0x8e   : > { %228 = vst [vmem:[%s208_s26] sm:$0xff] %v226_v9  ;;  %229 = vst [vmem:[%s208_s26 + $0x8] sm:$0xff] %v227_v10 }
  0x8f PF: > { %s13_s14 = sadd.s32 1, %s378_s14   ;;  %s441_s12 = smov %s374_s13 }
  0x90   : > { %p10_p5 = scmp.ge.s32.totalorder %s13_s14, 4   ;;  %s442_s13 = smov %s444_s15 }
  0x92   :  { %12 = sbr.rel (!%p10_p5) target bundleno = 2 (0x2), region = 62 }

// kernel: conv_bn_forward.2
= control target key start
LH: loop header
LB: loop body
LE: loop exit
PB: predicated region body
PF: predicated region fallthrough
CT: control target
= control target key end

     0   :  { %s1696_s12 = smov 0   ;;  %s1698_s13 = smov 0   ;;  %s2221_s0 = inlined_call_operand.vmem [shape: f32[2,324,4], index: 0, kind: input, shape index: {}]   ;;  %s2222_s1 = inlined_call_operand.vmem [shape: f32[36,128], index: 1, kind: input, shape index: {}]   ;;  %s2223_s2 = inlined_call_operand.vmem [shape: f32[2,8,256], index: 2, kind: output, shape index: {0}]   ;;  %s2224_s3 = inlined_call_operand.vmem [shape: f32[2,2,2,128], index: 3, kind: output, shape index: {1}]  }
   0x1   :  { %s1700_s14 = smov 0   ;;  %s1702_s15 = smov 0  }
   0x2   :  { %s1704_s16 = smov 0  }
   0x3 LB: > { %s23_s17 = sadd.s32 1, %s1658_s14  ;;  %s26_s18 = sadd.s32 1, %s1662_s15  ;;  %s1666_s16 = sphi %s1704_s16, %s14_s16   ;;  %s1662_s15 = sphi %s1702_s15, %s2228_s15   ;;  %s1658_s14 = sphi %s1700_s14, %s2227_s14   ;;  %s1654_s13 = sphi %s1698_s13, %s2226_s13   ;;  %s1650_s12 = sphi %s1696_s12, %s2225_s12  }
   0x4   : > { %p24_p0 = scmp.ge.s32.totalorder %s23_s17, 2  ;;  %p1427_p1 = scmp.ge.s32.totalorder %s1666_s16, 1 }
   0x5   : > { %p156_p2 = scmp.lt.s32.totalorder %s1666_s16, 5 }
   0x6   : > { %s2230_s17 = smov (%p24_p0, %s23_s17), 0  ;;  %s2232_s18 = smov (!%p24_p0, %s26_s18), %s1662_s15 }
   0x7   : > { %p157_p3 = pnand %p1427_p1, %p156_p2  ;;  %p28_p4 = scmp.ge.s32.totalorder %s2232_s18, 2 }
   0x8   : > { %p191_p5 = scmp.lt.s32.totalorder (!%p157_p3), %s1654_s13, 1  ;;  %s212_s19 = smul.u32 (!%p157_p3), 144, %s1650_s12  ;;  %v910_v11 = vld [vmem:[%s2222_s1] sm:$0xff] (!%p157_p3)  ;;  %v911_v12 = vld [vmem:[%s2222_s1 + $0x8] sm:$0xff] (!%p157_p3)  ;;  %v912_v14 = vld [vmem:[%s2222_s1 + $0x10] sm:$0xff] (!%p157_p3)  ;;  %vm964_vm0 = vcmask (!%p157_p3), 1043456  }
   0x9   : > { %s2234_s18 = smov (%p28_p4, %s2232_s18), 0  ;;  %160 = sbr.rel (%p157_p3) target bundleno = 679 (0x2a7), region = 28 }
   0xa   : > { %s1668_s25 = smov (!%p157_p3), 8   ;;  %s1669_s26 = smov (!%p157_p3), 4   ;;  %v1565_v13 = vpack.c.bf16 (!%p157_p3), %v911_v12, %v910_v11  ;;  %v913_v15 = vld [vmem:[%s2222_s1 + $0x18] sm:$0xff] (!%p157_p3)  ;;  %v914_v19 = vld [vmem:[%s2222_s1 + $0x20] sm:$0xf] (!%p157_p3)  ;;  %vm312_vm1 = vcmask (!%p157_p3), 31744  }
   0xb   : > { %s1670_s27 = smov (!%p157_p3), 12   ;;  %s1671_s28 = smov (!%p157_p3), 16   ;;  %v1569_v18 = vpack.c.bf16 (!%p157_p3), %v913_v15, %v912_v14  ;;  %vm315_vm2 = vcmask (!%p157_p3), 64512   ;;  %vm318_vm3 = vcmask (!%p157_p3), 97280   ;;  %vm321_vm4 = vcmask (!%p157_p3), 130048  }
   0xc   : > { %s1672_s29 = smov (!%p157_p3), 20   ;;  %s1673_s7 = smov (!%p157_p3), 24   ;;  %1566 = vmatprep.subr.bf16.mxu0 (!%p157_p3), %v1565_v13  ;;  %1573 = vmatprep.subr.bf16.mxu1 (!%p157_p3), %v1565_v13  ;;  %vm324_vm5 = vcmask (!%p157_p3), 162816   ;;  %vm327_vm6 = vcmask (!%p157_p3), 195584   ;;  %vm330_vm7 = vcmask (!%p157_p3), 228352   ;;  %vm333_vm8 = vcmask (!%p157_p3), 261120  }
   0xd   : > { %1568 = vmatpush3.bf16.msra.mxu0 (!%p157_p3), %v1565_v13  ;;  %1576 = vmatpush3.bf16.msra.mxu1 (!%p157_p3), %v1565_v13  ;;  %s1675_s22 = smov (!%p157_p3), 32   ;;  %vm915_vm9 = vcmask (!%p157_p3), 293888   ;;  %p198_p6 = scmp.lt.s32.totalorder (!%p157_p3), %s1650_s12, 1  ;;  %vm1171_vm10 = vcmask (!%p157_p3), 1040384  }
   0xe   : > { %1570 = vmatprep.subr.bf16.mxu0 (!%p157_p3), %v1569_v18  ;;  %1574 = vmatprep.subr.bf16.mxu1 (!%p157_p3), %v1569_v18 }
  0x10   : > { %s2236_s13 = smov (!%p191_p5, %s1654_s13), 1  ;;  %s2238_s12 = smov (!%p198_p6, %s1650_s12), 1 }
  0x11   : > { %s1579_s20 = smul.u32 328, %s2236_s13  ;;  %1572 = vmatpush3.bf16.msra.mxu0 %v1569_v18  ;;  %1577 = vmatpush3.bf16.msra.mxu1 %v1569_v18 }
  0x12   : > { %1539 = vmatprep.subr.msk.mxu0 %vm964_vm0, %v914_v19  ;;  %1575 = vmatprep.subr.msk.mxu1 %vm964_vm0, %v914_v19 }
  0x13   : > { %s195_s23 = scalar_lea.vmem %s2221_s0, %s1579_s20 }
  0x14   : > { %s1735_s24 = scalar_lea.vmem %s195_s23, %s212_s19  ;;  %s1674_s19 = smov 28  }
  0x15   : > { %v1435_v0 = vld [vmem:[%s1735_s24 + $0x2] sm:$0xff]  ;;  %v1436_v2 = vld [vmem:[%s1735_s24 + $0xa] sm:$0xff]  ;;  %v1746_v4 = vld [vmem:[%s1735_s24 + $0x1a] sm:$0xff]  ;;  %1540 = vmatpush3.msk.msra.mxu0 %vm964_vm0, %v914_v19  ;;  %1578 = vmatpush3.msk.msra.mxu1 %vm964_vm0, %v914_v19  ;;  %s1429_s23 = sshll.u32 %s2236_s13, 1 }
  0x16   : > { %v1433_v1 = vld [vmem:[%s1735_s24 + $0x1] sm:$0xff]  ;;  %258 = vrot.lane.b32.xlu1 %v1435_v0, %s1668_s25  ;;  %v1434_v3 = vld [vmem:[%s1735_s24 + $0x9] sm:$0xff]  ;;  %v1749_v5 = vld [vmem:[%s1735_s24 + $0x12] sm:$0xff] }
  0x17   : > { %250 = vrot.lane.b32.xlu0 %v1433_v1, %s1669_s26  ;;  %v1440_v6 = vld [vmem:[%s1735_s24 + $0x1b] sm:$0xff]  ;;  %v1439_v7 = vld [vmem:[%s1735_s24 + $0x13] sm:$0xff]  ;;  %v1763_v9 = vld [vmem:[%s1735_s24 + $0x24] sm:$0xff] }
  0x18   : > { %v1441_v8 = vld [vmem:[%s1735_s24 + $0x14] sm:$0xff]  ;;  %v1442_v10 = vld [vmem:[%s1735_s24 + $0x1c] sm:$0xff]  ;;  %v1445_v16 = vld [vmem:[%s1735_s24 + $0x25] sm:$0xff] }
  0x19   : > { %v1785_v17 = vld [vmem:[%s1735_s24 + $0x2c] sm:$0xff]  ;;  %v1809_v23 = vld [vmem:[%s1735_s24 + $0x36] sm:$0xff]  ;;  %v1818_v25 = vld [vmem:[%s1735_s24 + $0x3e] sm:$0xff] }
  0x1a   : > { %260 = vrot.lane.b32.xlu1 %v1436_v2, %s1668_s25  ;;  %v1447_v20 = vld [vmem:[%s1735_s24 + $0x26] sm:$0xff]  ;;  %v1448_v22 = vld [vmem:[%s1735_s24 + $0x2e] sm:$0xff]  ;;  %v1451_v24 = vld [vmem:[%s1735_s24 + $0x37] sm:$0xff] }
  0x1b   : > { %252 = vrot.lane.b32.xlu0 %v1434_v3, %s1669_s26  ;;  %v1446_v21 = vld [vmem:[%s1735_s24 + $0x2d] sm:$0xff]  ;;  %v1453_v26 = vld [vmem:[%s1735_s24 + $0x38] sm:$0xff]  ;;  %v1454_v28 = vld [vmem:[%s1735_s24 + $0x40] sm:$0xff] }
  0x1c   : > { %v1452_v27 = vld [vmem:[%s1735_s24 + $0x3f] sm:$0xff]  ;;  %v1839_v29 = vld [vmem:[%s1735_s24 + $0x48] sm:$0xff]  ;;  %v1848_v31 = vld [vmem:[%s1735_s24 + $0x50] sm:$0xff] }
  0x1d   : > { %v1457_v30 = vld [vmem:[%s1735_s24 + $0x49] sm:$0xff]  ;;  %v1458_v33 = vld [vmem:[%s1735_s24 + $0x51] sm:$0xff]  ;;  %v1869_v35 = vld [vmem:[%s1735_s24 + $0x5a] sm:$0xff] }
  0x1e   : > { %268 = vrot.lane.b32.xlu1 %v1746_v4, %s1670_s27  ;;  %v1459_v32 = vld [vmem:[%s1735_s24 + $0x4a] sm:$0xff]  ;;  %v1460_v34 = vld [vmem:[%s1735_s24 + $0x52] sm:$0xff]  ;;  %v1463_v40 = vld [vmem:[%s1735_s24 + $0x5b] sm:$0xff] }
  0x1f   : > { %266 = vrot.lane.b32.xlu0 %v1749_v5, %s1670_s27  ;;  %v1880_v41 = vld [vmem:[%s1735_s24 + $0x62] sm:$0xff]  ;;  %v1910_v60 = vld [vmem:[%s1735_s24 + $0x6c] sm:$0xff]  ;;  %v1932_v14 = vld [vmem:[%s1735_s24 + $0x74] sm:$0xff] }
  0x20   : > { %v1465_v46 = vld [vmem:[%s1735_s24 + $0x5c] sm:$0xff]  ;;  %v1466_v52 = vld [vmem:[%s1735_s24 + $0x64] sm:$0xff]  ;;  %v1469_v13 = vld [vmem:[%s1735_s24 + $0x6d] sm:$0xff] }
  0x21   : > { %v1464_v47 = vld [vmem:[%s1735_s24 + $0x63] sm:$0xff] }
  0x22   : > { %276 = vrot.lane.b32.xlu1 %v1440_v6, %s1671_s28  ;;  %v214_v55 = vld [vmem:[%s1735_s24] sm:$0xff]  ;;  %v215_v0 = vld [vmem:[%s1735_s24 + $0x8] sm:$0xff] }
  0x23   : > { %274 = vrot.lane.b32.xlu0 %v1439_v7, %s1671_s28 }
  0x26   : > { %348 = vrot.lane.b32.xlu1 %v1439_v7, %s1669_s26 }
  0x27   : > { %282 = vrot.lane.b32.xlu0 %v1441_v8, %s1672_s29 }
  0x2a   : > { %290 = vrot.lane.b32.xlu1 %v1763_v9, %s1673_s7 }
  0x2b   : > { %284 = vrot.lane.b32.xlu0 %v1442_v10, %s1672_s29 }
  0x2e   : > { %354 = vrot.lane.b32.xlu1 %v1441_v8, %s1668_s25 }
  0x2f   : > { %350 = vrot.lane.b32.xlu0 %v1440_v6, %s1669_s26 }
  0x32   : > { %298 = vrot.lane.b32.xlu1 %v1445_v16, %s1674_s19 }
  0x33   : > { %292 = vrot.lane.b32.xlu0 %v1785_v17, %s1673_s7 }
  0x36   : > { %360 = vrot.lane.b32.xlu1 %v1763_v9, %s1670_s27 }
  0x37   : > { %356 = vrot.lane.b32.xlu0 %v1442_v10, %s1668_s25 }
  0x3a   : > { %306 = vrot.lane.b32.xlu1 %v1447_v20, %s1675_s22 }
  0x3b   : > { %300 = vrot.lane.b32.xlu0 %v1446_v21, %s1674_s19 }
  0x3e   : > { %366 = vrot.lane.b32.xlu1 %v1445_v16, %s1671_s28 }
  0x3f   : > { %362 = vrot.lane.b32.xlu0 %v1785_v17, %s1670_s27 }
  0x42   : > { %368 = vrot.lane.b32.xlu1 %v1446_v21, %s1671_s28 }
  0x43   : > { %308 = vrot.lane.b32.xlu0 %v1448_v22, %s1675_s22 }
  0x46   : > { %430 = vrot.lane.b32.xlu1 %v1445_v16, %s1669_s26 }
  0x47   : > { %372 = vrot.lane.b32.xlu0 %v1447_v20, %s1672_s29 }
  0x4a   : > { %380 = vrot.lane.b32.xlu1 %v1809_v23, %s1673_s7 }
  0x4b   : > { %374 = vrot.lane.b32.xlu0 %v1448_v22, %s1672_s29 }
  0x4e   : > { %436 = vrot.lane.b32.xlu1 %v1447_v20, %s1668_s25 }
  0x4f   : > { %432 = vrot.lane.b32.xlu0 %v1446_v21, %s1669_s26 }
  0x52   : > { %388 = vrot.lane.b32.xlu1 %v1451_v24, %s1674_s19 }
  0x53   : > { %382 = vrot.lane.b32.xlu0 %v1818_v25, %s1673_s7 }
  0x56   : > { %442 = vrot.lane.b32.xlu1 %v1809_v23, %s1670_s27 }
  0x57   : > { %438 = vrot.lane.b32.xlu0 %v1448_v22, %s1668_s25 }
  0x5a   : > { %396 = vrot.lane.b32.xlu1 %v1453_v26, %s1675_s22 }
  0x5b   : > { %390 = vrot.lane.b32.xlu0 %v1452_v27, %s1674_s19 }
  0x5e   : > { %448 = vrot.lane.b32.xlu1 %v1451_v24, %s1671_s28 }
  0x5f   : > { %444 = vrot.lane.b32.xlu0 %v1818_v25, %s1670_s27 }
  0x62   : > { %450 = vrot.lane.b32.xlu1 %v1452_v27, %s1671_s28 }
  0x63   : > { %398 = vrot.lane.b32.xlu0 %v1454_v28, %s1675_s22 }
  0x66   : > { %512 = vrot.lane.b32.xlu1 %v1451_v24, %s1669_s26 }
  0x67   : > { %454 = vrot.lane.b32.xlu0 %v1453_v26, %s1672_s29 }
  0x6a   : > { %462 = vrot.lane.b32.xlu1 %v1839_v29, %s1673_s7 }
  0x6b   : > { %456 = vrot.lane.b32.xlu0 %v1454_v28, %s1672_s29 }
  0x6e   : > { %518 = vrot.lane.b32.xlu1 %v1453_v26, %s1668_s25 }
  0x6f   : > { %514 = vrot.lane.b32.xlu0 %v1452_v27, %s1669_s26 }
  0x72   : > { %470 = vrot.lane.b32.xlu1 %v1457_v30, %s1674_s19 }
  0x73   : > { %464 = vrot.lane.b32.xlu0 %v1848_v31, %s1673_s7 }
  0x76   : > { %524 = vrot.lane.b32.xlu1 %v1839_v29, %s1670_s27 }
  0x77   : > { %520 = vrot.lane.b32.xlu0 %v1454_v28, %s1668_s25  ;;  %v1471_v28 = vld [vmem:[%s1735_s24 + $0x6e] sm:$0xff] }
  0x7a   : > { %478 = vrot.lane.b32.xlu1 %v1459_v32, %s1675_s22 }
  0x7b   : > { %472 = vrot.lane.b32.xlu0 %v1458_v33, %s1674_s19 }
  0x7e   : > { %530 = vrot.lane.b32.xlu1 %v1457_v30, %s1671_s28 }
  0x7f   : > { %526 = vrot.lane.b32.xlu0 %v1848_v31, %s1670_s27 }
  0x82   : > { %532 = vrot.lane.b32.xlu1 %v1458_v33, %s1671_s28 }
  0x83   : > { %480 = vrot.lane.b32.xlu0 %v1460_v34, %s1675_s22 }
  0x86   : > { %594 = vrot.lane.b32.xlu1 %v1457_v30, %s1669_s26  ;;  %v1470_v30 = vld [vmem:[%s1735_s24 + $0x75] sm:$0xff] }
  0x87   : > { %536 = vrot.lane.b32.xlu0 %v1459_v32, %s1672_s29 }
  0x88   : > { %v259_v36 = vpop.permute.xlu1 %258 }
  0x89   : > { %v251_v37 = vpop.permute.xlu0 %250 }
  0x8a   : > { %544 = vrot.lane.b32.xlu1 %v1869_v35, %s1673_s7  ;;  %v313_v56 = vsel %vm312_vm1, %v214_v55, %v251_v37  ;;  %v1472_v37 = vld [vmem:[%s1735_s24 + $0x76] sm:$0xff] }
  0x8b   : > { %538 = vrot.lane.b32.xlu0 %v1460_v34, %s1672_s29  ;;  %v316_v59 = vsel %vm315_vm2, %v313_v56, %v259_v36 }
  0x8c   : > { %v1874_v38 = vpop.permute.xlu1 %260 }
  0x8d   : > { %v253_v39 = vpop.permute.xlu0 %252 }
  0x8e   : > { %600 = vrot.lane.b32.xlu1 %v1459_v32, %s1668_s25  ;;  %v314_v6 = vsel %vm312_vm1, %v215_v0, %v253_v39 }
  0x8f   : > { %596 = vrot.lane.b32.xlu0 %v1458_v33, %s1669_s26  ;;  %v317_v12 = vsel %vm315_vm2, %v314_v6, %v1874_v38 }
  0x90   : > { %v269_v42 = vpop.permute.xlu1 %268 }
  0x91   : > { %v267_v43 = vpop.permute.xlu0 %266  ;;  %v320_v15 = vsel %vm318_vm3, %v317_v12, %v269_v42 }
  0x92   : > { %552 = vrot.lane.b32.xlu1 %v1463_v40, %s1674_s19  ;;  %v319_v61 = vsel %vm318_vm3, %v316_v59, %v267_v43  ;;  %v1994_v59 = vld [vmem:[%s1735_s24 + $0x86] sm:$0xff] }
  0x93   : > { %546 = vrot.lane.b32.xlu0 %v1880_v41, %s1673_s7 }
  0x94   : > { %v277_v44 = vpop.permute.xlu1 %276 }
  0x95   : > { %v275_v45 = vpop.permute.xlu0 %274  ;;  %v323_v19 = vsel %vm321_vm4, %v320_v15, %v277_v44  ;;  %v1478_v15 = vld [vmem:[%s1735_s24 + $0x88] sm:$0xff] }
  0x96   : > { %606 = vrot.lane.b32.xlu1 %v1869_v35, %s1670_s27  ;;  %v322_v1 = vsel %vm321_vm4, %v319_v61, %v275_v45  ;;  %v1971_v45 = vld [vmem:[%s1735_s24 + $0x7e] sm:$0xff] }
  0x97   : > { %602 = vrot.lane.b32.xlu0 %v1460_v34, %s1668_s25 }
  0x98   : > { %v1890_v48 = vpop.permute.xlu1 %348 }
  0x99   : > { %v283_v49 = vpop.permute.xlu0 %282  ;;  %v402_v43 = vsel %vm312_vm1, %v1749_v5, %v1890_v48 }
  0x9a   : > { %560 = vrot.lane.b32.xlu1 %v1465_v46, %s1675_s22  ;;  %v325_v2 = vsel %vm324_vm5, %v322_v1, %v283_v49 }
  0x9b   : > { %554 = vrot.lane.b32.xlu0 %v1464_v47, %s1674_s19 }
  0x9c   : > { %v291_v50 = vpop.permute.xlu1 %290 }
  0x9d   : > { %v285_v51 = vpop.permute.xlu0 %284  ;;  %v328_v3 = vsel %vm327_vm6, %v325_v2, %v291_v50 }
  0x9e   : > { %612 = vrot.lane.b32.xlu1 %v1463_v40, %s1671_s28  ;;  %v326_v20 = vsel %vm324_vm5, %v323_v19, %v285_v51 }
  0x9f   : > { %608 = vrot.lane.b32.xlu0 %v1880_v41, %s1670_s27 }
  0xa0   : > { %v1898_v53 = vpop.permute.xlu1 %354 }
  0xa1   : > { %v1900_v54 = vpop.permute.xlu0 %350  ;;  %v404_v44 = vsel %vm315_vm2, %v402_v43, %v1898_v53  ;;  %v1480_v43 = vld [vmem:[%s1735_s24 + $0x98] sm:$0xff] }
  0xa2   : > { %614 = vrot.lane.b32.xlu1 %v1464_v47, %s1671_s28  ;;  %v403_v56 = vsel %vm312_vm1, %v1746_v4, %v1900_v54 }
  0xa3   : > { %562 = vrot.lane.b32.xlu0 %v1466_v52, %s1675_s22 }
  0xa4   : > { %v299_v57 = vpop.permute.xlu1 %298 }
  0xa5   : > { %v293_v58 = vpop.permute.xlu0 %292  ;;  %v331_v7 = vsel %vm330_vm7, %v328_v3, %v299_v57 }
  0xa6   : > { %676 = vrot.lane.b32.xlu1 %v1463_v40, %s1669_s26  ;;  %v329_v21 = vsel %vm327_vm6, %v326_v20, %v293_v58  ;;  %v1475_v58 = vld [vmem:[%s1735_s24 + $0x7f] sm:$0xff] }
  0xa7   : > { %618 = vrot.lane.b32.xlu0 %v1465_v46, %s1672_s29 }
  0xa8   : > { %v361_v62 = vpop.permute.xlu1 %360 }
  0xa9   : > { %v1913_v63 = vpop.permute.xlu0 %356 }
  0xaa   : > { %626 = vrot.lane.b32.xlu1 %v1910_v60, %s1673_s7  ;;  %v405_v57 = vsel %vm315_vm2, %v403_v56, %v1913_v63 }
  0xab   : > { %620 = vrot.lane.b32.xlu0 %v1466_v52, %s1672_s29 }
  0xac   : > { %v307_v8 = vpop.permute.xlu1 %306 }
  0xad   : > { %v301_v10 = vpop.permute.xlu0 %300  ;;  %v334_v11 = vsel %vm333_vm8, %v331_v7, %v307_v8  ;;  %v1477_v7 = vld [vmem:[%s1735_s24 + $0x80] sm:$0xff] }
  0xae   : > { %682 = vrot.lane.b32.xlu1 %v1465_v46, %s1668_s25  ;;  %1541 = vmatprep.mubr.msk.f32.mxu0 %vm915_vm9, %v334_v11  ;;  %v332_v22 = vsel %vm330_vm7, %v329_v21, %v301_v10  ;;  %v406_v46 = vsel %vm318_vm3, %v404_v44, %v361_v62  ;;  %v1476_v8 = vld [vmem:[%s1735_s24 + $0x87] sm:$0xff] }
  0xaf   : > { %678 = vrot.lane.b32.xlu0 %v1464_v47, %s1669_s26 }
  0xb0   : > { %v367_v16 = vpop.permute.xlu1 %366 }
  0xb1   : > { %v363_v18 = vpop.permute.xlu0 %362  ;;  %v408_v50 = vsel %vm321_vm4, %v406_v46, %v367_v16 }
  0xb2   : > { %634 = vrot.lane.b32.xlu1 %v1469_v13, %s1674_s19  ;;  %v407_v61 = vsel %vm318_vm3, %v405_v57, %v363_v18 }
  0xb3   : > { %628 = vrot.lane.b32.xlu0 %v1932_v14, %s1673_s7 }
  0xb4   : > { %v369_v24 = vpop.permute.xlu1 %368 }
  0xb5   : > { %v309_v26 = vpop.permute.xlu0 %308  ;;  %v409_v4 = vsel %vm321_vm4, %v407_v61, %v369_v24  ;;  %v1479_v24 = vld [vmem:[%s1735_s24 + $0x90] sm:$0xff]  ;;  %v1484_v61 = vld [vmem:[%s1735_s24 + $0x9a] sm:$0xff] }
  0xb6   : > { %v335_v27 = vsel %vm333_vm8, %v332_v22, %v309_v26  ;;  %688 = vrot.lane.b32.xlu1 %v1910_v60, %s1670_s27 }
  0xb7   : > { %684 = vrot.lane.b32.xlu0 %v1466_v52, %s1668_s25  ;;  %1542 = vmatmul.mubr.msk.f32.vlgmr.msra.gmra.mrb[0].mxu0 %vm915_vm9, %v335_v27 }
  0xb8   : > { %v1949_v32 = vpop.permute.xlu1 %430 }
  0xb9   : > { %v373_v33 = vpop.permute.xlu0 %372  ;;  %v484_v21 = vsel %vm312_vm1, %v1763_v9, %v1949_v32 }
  0xba   : > { %642 = vrot.lane.b32.xlu1 %v1471_v28, %s1675_s22  ;;  %v410_v5 = vsel %vm324_vm5, %v408_v50, %v373_v33 }
  0xbb   : > { %636 = vrot.lane.b32.xlu0 %v1470_v30, %s1674_s19 }
  0xbc   : > { %v381_v34 = vpop.permute.xlu1 %380 }
  0xbd   : > { %v375_v36 = vpop.permute.xlu0 %374  ;;  %v412_v48 = vsel %vm327_vm6, %v410_v5, %v381_v34 }
  0xbe   : > { %694 = vrot.lane.b32.xlu1 %v1469_v13, %s1671_s28  ;;  %v411_v54 = vsel %vm324_vm5, %v409_v4, %v375_v36 }
  0xbf   : > { %690 = vrot.lane.b32.xlu0 %v1932_v14, %s1670_s27 }
  0xc0   : > { %v1957_v38 = vpop.permute.xlu1 %436 }
  0xc1   : > { %v1959_v39 = vpop.permute.xlu0 %432  ;;  %v486_v22 = vsel %vm315_vm2, %v484_v21, %v1957_v38 }
  0xc2   : > { %696 = vrot.lane.b32.xlu1 %v1470_v30, %s1671_s28  ;;  %v485_v38 = vsel %vm312_vm1, %v1785_v17, %v1959_v39 }
  0xc3   : > { %644 = vrot.lane.b32.xlu0 %v1472_v37, %s1675_s22 }
  0xc4   : > { %v389_v40 = vpop.permute.xlu1 %388 }
  0xc5   : > { %v383_v42 = vpop.permute.xlu0 %382  ;;  %v414_v51 = vsel %vm330_vm7, %v412_v48, %v389_v40 }
  0xc6   : > { %758 = vrot.lane.b32.xlu1 %v1469_v13, %s1669_s26  ;;  %v413_v63 = vsel %vm327_vm6, %v411_v54, %v383_v42  ;;  %v1481_v42 = vld [vmem:[%s1735_s24 + $0x91] sm:$0xff] }
  0xc7   : > { %700 = vrot.lane.b32.xlu0 %v1471_v28, %s1672_s29 }
  0xc8   : > { %v443_v47 = vpop.permute.xlu1 %442 }
  0xc9   : > { %v1974_v49 = vpop.permute.xlu0 %438  ;;  %v488_v26 = vsel %vm318_vm3, %v486_v22, %v443_v47 }
  0xca   : > { %708 = vrot.lane.b32.xlu1 %v1971_v45, %s1673_s7  ;;  %v487_v40 = vsel %vm315_vm2, %v485_v38, %v1974_v49 }
  0xcb   : > { %702 = vrot.lane.b32.xlu0 %v1472_v37, %s1672_s29 }
  0xcc   : > { %v397_v52 = vpop.permute.xlu1 %396 }
  0xcd   : > { %v391_v53 = vpop.permute.xlu0 %390  ;;  %v416_v55 = vsel %vm333_vm8, %v414_v51, %v397_v52  ;;  %v1483_v52 = vld [vmem:[%s1735_s24 + $0x92] sm:$0xff] }
  0xce   : > { %764 = vrot.lane.b32.xlu1 %v1471_v28, %s1668_s25  ;;  %1544 = vmatprep.mubr.msk.f32.mxu0 %vm915_vm9, %v416_v55  ;;  %v415_v1 = vsel %vm330_vm7, %v413_v63, %v391_v53  ;;  %v1482_v53 = vld [vmem:[%s1735_s24 + $0x99] sm:$0xff] }
  0xcf   : > { %760 = vrot.lane.b32.xlu0 %v1470_v30, %s1669_s26 }
  0xd0   : > { %v449_v62 = vpop.permute.xlu1 %448 }
  0xd1   : > { %v445_v0 = vpop.permute.xlu0 %444  ;;  %v490_v30 = vsel %vm321_vm4, %v488_v26, %v449_v62  ;;  %v1489_v26 = vld [vmem:[%s1735_s24 + $0xa4] sm:$0xff] }
  0xd2   : > { %716 = vrot.lane.b32.xlu1 %v1475_v58, %s1674_s19  ;;  %v489_v44 = vsel %vm318_vm3, %v487_v40, %v445_v0 }
  0xd3   : > { %710 = vrot.lane.b32.xlu0 %v1994_v59, %s1673_s7 }
  0xd4   : > { %v451_v2 = vpop.permute.xlu1 %450 }
  0xd5   : > { %v399_v3 = vpop.permute.xlu0 %398  ;;  %v491_v50 = vsel %vm321_vm4, %v489_v44, %v451_v2  ;;  %v1486_v2 = vld [vmem:[%s1735_s24 + $0xaa] sm:$0xff] }
  0xd6   : > { %v417_v6 = vsel %vm333_vm8, %v415_v1, %v399_v3  ;;  %770 = vrot.lane.b32.xlu1 %v1971_v45, %s1670_s27  ;;  %v1485_v3 = vld [vmem:[%s1735_s24 + $0xa2] sm:$0xff] }
  0xd7   : > { %766 = vrot.lane.b32.xlu0 %v1472_v37, %s1668_s25  ;;  %1545 = vmatmul.mubr.msk.f32.gmra.mrb[2].mxu0 %vm915_vm9, %v417_v6 }
  0xd8   : > { %v2011_v10 = vpop.permute.xlu1 %512 }
  0xd9   : > { %v455_v11 = vpop.permute.xlu0 %454  ;;  %v566_v63 = vsel %vm312_vm1, %v1809_v23, %v2011_v10  ;;  %v1488_v10 = vld [vmem:[%s1735_s24 + $0xab] sm:$0xff] }
  0xda   : > { %724 = vrot.lane.b32.xlu1 %v1477_v7, %s1675_s22  ;;  %v492_v33 = vsel %vm324_vm5, %v490_v30, %v455_v11 }
  0xdb   : > { %718 = vrot.lane.b32.xlu0 %v1476_v8, %s1674_s19 }
  0xdc   : > { %v463_v12 = vpop.permute.xlu1 %462 }
  0xdd   : > { %v457_v13 = vpop.permute.xlu0 %456  ;;  %v494_v9 = vsel %vm327_vm6, %v492_v33, %v463_v12 }
  0xde   : > { %776 = vrot.lane.b32.xlu1 %v1475_v58, %s1671_s28  ;;  %v493_v17 = vsel %vm324_vm5, %v491_v50, %v457_v13  ;;  %v1487_v13 = vld [vmem:[%s1735_s24 + $0xa3] sm:$0xff] }
  0xdf   : > { %772 = vrot.lane.b32.xlu0 %v1994_v59, %s1670_s27 }
  0xe0   : > { %v2019_v16 = vpop.permute.xlu1 %518 }
  0xe1   : > { %v2021_v18 = vpop.permute.xlu0 %514  ;;  %v568_v1 = vsel %vm315_vm2, %v566_v63, %v2019_v16 }
  0xe2   : > { %778 = vrot.lane.b32.xlu1 %v1476_v8, %s1671_s28  ;;  %v567_v21 = vsel %vm312_vm1, %v1818_v25, %v2021_v18 }
  0xe3   : > { %726 = vrot.lane.b32.xlu0 %v1478_v15, %s1675_s22 }
  0xe4   : > { %v471_v19 = vpop.permute.xlu1 %470 }
  0xe5   : > { %v465_v20 = vpop.permute.xlu0 %464  ;;  %v496_v32 = vsel %vm330_vm7, %v494_v9, %v471_v19 }
  0xe6   : > { %840 = vrot.lane.b32.xlu1 %v1475_v58, %s1669_s26  ;;  %v495_v39 = vsel %vm327_vm6, %v493_v17, %v465_v20 }
  0xe7   : > { %782 = vrot.lane.b32.xlu0 %v1477_v7, %s1672_s29 }
  0xe8   : > { %v525_v27 = vpop.permute.xlu1 %524 }
  0xe9   : > { %v2034_v28 = vpop.permute.xlu0 %520  ;;  %v570_v6 = vsel %vm318_vm3, %v568_v1, %v525_v27 }
  0xea   : > { %790 = vrot.lane.b32.xlu1 %v1479_v24, %s1673_s7  ;;  %v569_v22 = vsel %vm315_vm2, %v567_v21, %v2034_v28 }
  0xeb   : > { %784 = vrot.lane.b32.xlu0 %v1478_v15, %s1672_s29 }
  0xec   : > { %v479_v34 = vpop.permute.xlu1 %478 }
  0xed   : > { %v473_v36 = vpop.permute.xlu0 %472  ;;  %v498_v37 = vsel %vm333_vm8, %v496_v32, %v479_v34 }
  0xee   : > { %846 = vrot.lane.b32.xlu1 %v1477_v7, %s1668_s25  ;;  %1547 = vmatprep.mubr.msk.f32.mxu0 %vm915_vm9, %v498_v37  ;;  %v497_v49 = vsel %vm330_vm7, %v495_v39, %v473_v36 }
  0xef   : > { %842 = vrot.lane.b32.xlu0 %v1476_v8, %s1669_s26 }
  0xf0   : > { %v531_v46 = vpop.permute.xlu1 %530 }
  0xf1   : > { %v527_v47 = vpop.permute.xlu0 %526  ;;  %v572_v11 = vsel %vm321_vm4, %v570_v6, %v531_v46 }
  0xf2   : > { %798 = vrot.lane.b32.xlu1 %v1481_v42, %s1674_s19  ;;  %v571_v27 = vsel %vm318_vm3, %v569_v22, %v527_v47 }
  0xf3   : > { %792 = vrot.lane.b32.xlu0 %v1480_v43, %s1673_s7 }
  0xf4   : > { %v533_v5 = vpop.permute.xlu1 %532 }
  0xf5   : > { %v481_v48 = vpop.permute.xlu0 %480  ;;  %v573_v9 = vsel %vm321_vm4, %v571_v27, %v533_v5 }
  0xf6   : > { %v499_v51 = vsel %vm333_vm8, %v497_v49, %v481_v48  ;;  %852 = vrot.lane.b32.xlu1 %v1479_v24, %s1670_s27  ;;  %v1490_v24 = vld [vmem:[%s1735_s24 + $0xac] sm:$0xff]  ;;  %s201_s24 = sadd.s32 %s1429_s23, %s2238_s12 }
  0xf7   : > { %848 = vrot.lane.b32.xlu0 %v1478_v15, %s1668_s25  ;;  %1548 = vmatmul.mubr.msk.f32.gmra.mrb[4].mxu0 %vm915_vm9, %v499_v51  ;;  %s1432_s25 = sshll.u32 %s201_s24, 1 }
  0xf8   : > { %v2066_v55 = vpop.permute.xlu1 %594 }
  0xf9   : > { %v537_v56 = vpop.permute.xlu0 %536  ;;  %v648_v50 = vsel %vm312_vm1, %v1839_v29, %v2066_v55 }
  0xfa   : > { %806 = vrot.lane.b32.xlu1 %v1483_v52, %s1675_s22  ;;  %v574_v12 = vsel %vm324_vm5, %v572_v11, %v537_v56 }
  0xfb   : > { %800 = vrot.lane.b32.xlu0 %v1482_v53, %s1674_s19 }
  0xfc   : > { %v545_v57 = vpop.permute.xlu1 %544 }
  0xfd   : > { %v539_v58 = vpop.permute.xlu0 %538  ;;  %v576_v23 = vsel %vm327_vm6, %v574_v12, %v545_v57 }
  0xfe   : > { %858 = vrot.lane.b32.xlu1 %v1481_v42, %s1671_s28  ;;  %v575_v32 = vsel %vm324_vm5, %v573_v9, %v539_v58 }
  0xff   : > { %854 = vrot.lane.b32.xlu0 %v1480_v43, %s1670_s27 }
 0x100   : > { %v601_v62 = vpop.permute.xlu1 %600 }
 0x101   : > { %v2073_v0 = vpop.permute.xlu0 %596  ;;  %v650_v17 = vsel %vm315_vm2, %v648_v50, %v601_v62 }
 0x102   : > { %860 = vrot.lane.b32.xlu1 %v1482_v53, %s1671_s28  ;;  %v649_v29 = vsel %vm312_vm1, %v1848_v31, %v2073_v0  ;;  %s211_s28 = scalar_lea.vmem %s2224_s3, %s1432_s25 }
 0x103   : > { %808 = vrot.lane.b32.xlu0 %v1484_v61, %s1675_s22 }
 0x104   : > { %v553_v4 = vpop.permute.xlu1 %552 }
 0x105   : > { %v547_v54 = vpop.permute.xlu0 %546  ;;  %v578_v15 = vsel %vm330_vm7, %v576_v23, %v553_v4 }
 0x106   : > { %866 = vrot.lane.b32.xlu1 %v1484_v61, %s1672_s29  ;;  %v577_v25 = vsel %vm327_vm6, %v575_v32, %v547_v54 }
 0x107   : > { %864 = vrot.lane.b32.xlu0 %v1483_v52, %s1672_s29  ;;  %s1430_s29 = sshll.u32 %s201_s24, 3 }
 0x108   : > { %v607_v7 = vpop.permute.xlu1 %606  ;;  %s203_s4 = scalar_lea.vmem %s2223_s2, %s1430_s29 }
 0x109   : > { %v603_v8 = vpop.permute.xlu0 %602  ;;  %v652_v39 = vsel %vm318_vm3, %v650_v17, %v607_v7 }
 0x10a   : > { %874 = vrot.lane.b32.xlu1 %v1486_v2, %s1673_s7  ;;  %v651_v55 = vsel %vm315_vm2, %v649_v29, %v603_v8 }
 0x10b   : > { %872 = vrot.lane.b32.xlu0 %v1485_v3, %s1673_s7 }
 0x10c   : > { %v561_v16 = vpop.permute.xlu1 %560 }
 0x10d   : > { %v555_v19 = vpop.permute.xlu0 %554  ;;  %v580_v20 = vsel %vm333_vm8, %v578_v15, %v561_v16 }
 0x10e   : > { %882 = vrot.lane.b32.xlu1 %v1488_v10, %s1674_s19  ;;  %1550 = vmatprep.mubr.msk.f32.mxu0 %vm915_vm9, %v580_v20  ;;  %v579_v18 = vsel %vm330_vm7, %v577_v25, %v555_v19 }
 0x10f   : > { %880 = vrot.lane.b32.xlu0 %v1487_v13, %s1674_s19 }
 0x110   : > { %v613_v30 = vpop.permute.xlu1 %612 }
 0x111   : > { %v609_v33 = vpop.permute.xlu0 %608  ;;  %v654_v48 = vsel %vm321_vm4, %v652_v39, %v613_v30 }
 0x112   : > { %890 = vrot.lane.b32.xlu1 %v1490_v24, %s1675_s22  ;;  %v653_v61 = vsel %vm318_vm3, %v651_v55, %v609_v33 }
 0x113   : > { %888 = vrot.lane.b32.xlu0 %v1489_v26, %s1675_s22 }
 0x114   : > { %v615_v28 = vpop.permute.xlu1 %614 }
 0x115   : > { %v563_v34 = vpop.permute.xlu0 %562  ;;  %v655_v54 = vsel %vm321_vm4, %v653_v61, %v615_v28 }
 0x116   : > { %v581_v36 = vsel %vm333_vm8, %v579_v18, %v563_v34 }
 0x117   : > { %1551 = vmatmul.mubr.msk.f32.gmra.mrb[6].mxu0 %vm915_vm9, %v581_v36 }
 0x118   : > { %v677_v37 = vpop.permute.xlu1 %676 }
 0x119   : > { %v619_v38 = vpop.permute.xlu0 %618  ;;  %v730_v15 = vsel %vm312_vm1, %v1869_v35, %v677_v37 }
 0x11a   : > { %v656_v51 = vsel %vm324_vm5, %v654_v48, %v619_v38 }
 0x11c   : > { %v627_v40 = vpop.permute.xlu1 %626 }
 0x11d   : > { %v621_v42 = vpop.permute.xlu0 %620  ;;  %v658_v52 = vsel %vm327_vm6, %v656_v51, %v627_v40 }
 0x11e   : > { %v657_v63 = vsel %vm324_vm5, %v655_v54, %v621_v42 }
 0x120   : > { %v683_v43 = vpop.permute.xlu1 %682 }
 0x121   : > { %v679_v44 = vpop.permute.xlu0 %678  ;;  %v732_v16 = vsel %vm315_vm2, %v730_v15, %v683_v43 }
 0x122   : > { %v731_v35 = vsel %vm312_vm1, %v1880_v41, %v679_v44 }
 0x124   : > { %v635_v46 = vpop.permute.xlu1 %634 }
 0x125   : > { %v629_v47 = vpop.permute.xlu0 %628  ;;  %v660_v53 = vsel %vm330_vm7, %v658_v52, %v635_v46 }
 0x126   : > { %v659_v1 = vsel %vm327_vm6, %v657_v63, %v629_v47 }
 0x128   : > { %v689_v49 = vpop.permute.xlu1 %688 }
 0x129   : > { %v685_v5 = vpop.permute.xlu0 %684  ;;  %v734_v19 = vsel %vm318_vm3, %v732_v16, %v689_v49 }
 0x12a   : > { %v733_v32 = vsel %vm315_vm2, %v731_v35, %v685_v5 }
 0x12c   : > { %v643_v56 = vpop.permute.xlu1 %642 }
 0x12d   : > { %v637_v57 = vpop.permute.xlu0 %636  ;;  %v662_v58 = vsel %vm333_vm8, %v660_v53, %v643_v56 }
 0x12e   : > { %1553 = vmatprep.mubr.msk.f32.mxu1 %vm915_vm9, %v662_v58  ;;  %v661_v2 = vsel %vm330_vm7, %v659_v1, %v637_v57 }
 0x130   : > { %v695_v62 = vpop.permute.xlu1 %694 }
 0x131   : > { %v691_v4 = vpop.permute.xlu0 %690  ;;  %v736_v22 = vsel %vm321_vm4, %v734_v19, %v695_v62 }
 0x132   : > { %v735_v25 = vsel %vm318_vm3, %v733_v32, %v691_v4 }
 0x134   : > { %v697_v3 = vpop.permute.xlu1 %696 }
 0x135   : > { %v645_v6 = vpop.permute.xlu0 %644  ;;  %v737_v34 = vsel %vm321_vm4, %v735_v25, %v697_v3 }
 0x136   : > { %v663_v31 = vsel %vm333_vm8, %v661_v2, %v645_v6 }
 0x137   : > { %1554 = vmatmul.mubr.msk.f32.vlgmr.msra.gmra.mrb[0].mxu1 %vm915_vm9, %v663_v31 }
 0x138   : > { %v759_v0 = vpop.permute.xlu1 %758 }
 0x139   : > { %v701_v7 = vpop.permute.xlu0 %700  ;;  %v812_v5 = vsel %vm312_vm1, %v1910_v60, %v759_v0 }
 0x13a   : > { %v738_v24 = vsel %vm324_vm5, %v736_v22, %v701_v7 }
 0x13c   : > { %v709_v8 = vpop.permute.xlu1 %708 }
 0x13d   : > { %v703_v11 = vpop.permute.xlu0 %702  ;;  %v740_v26 = vsel %vm327_vm6, %v738_v24, %v709_v8 }
 0x13e   : > { %v739_v36 = vsel %vm324_vm5, %v737_v34, %v703_v11 }
 0x140   : > { %v765_v12 = vpop.permute.xlu1 %764 }
 0x141   : > { %v761_v23 = vpop.permute.xlu0 %760  ;;  %v814_v48 = vsel %vm315_vm2, %v812_v5, %v765_v12 }
 0x142   : > { %v813_v60 = vsel %vm312_vm1, %v1932_v14, %v761_v23 }
 0x144   : > { %v717_v10 = vpop.permute.xlu1 %716 }
 0x145   : > { %v711_v13 = vpop.permute.xlu0 %710  ;;  %v742_v27 = vsel %vm330_vm7, %v740_v26, %v717_v10 }
 0x146   : > { %v741_v37 = vsel %vm327_vm6, %v739_v36, %v711_v13 }
 0x148   : > { %v771_v20 = vpop.permute.xlu1 %770 }
 0x149   : > { %v767_v21 = vpop.permute.xlu0 %766  ;;  %v816_v51 = vsel %vm318_vm3, %v814_v48, %v771_v20 }
 0x14a   : > { %v815_v4 = vsel %vm315_vm2, %v813_v60, %v767_v21 }
 0x14c   : > { %v725_v30 = vpop.permute.xlu1 %724 }
 0x14d   : > { %v719_v33 = vpop.permute.xlu0 %718  ;;  %v744_v9 = vsel %vm333_vm8, %v742_v27, %v725_v30 }
 0x14e   : > { %1556 = vmatprep.mubr.msk.f32.mxu1 %vm915_vm9, %v744_v9  ;;  %v743_v38 = vsel %vm330_vm7, %v741_v37, %v719_v33 }
 0x150   : > { %v777_v18 = vpop.permute.xlu1 %776 }
 0x151   : > { %v773_v28 = vpop.permute.xlu0 %772  ;;  %v818_v56 = vsel %vm321_vm4, %v816_v51, %v777_v18 }
 0x152   : > { %v817_v54 = vsel %vm318_vm3, %v815_v4, %v773_v28 }
 0x154   : > { %v779_v40 = vpop.permute.xlu1 %778 }
 0x155   : > { %v727_v42 = vpop.permute.xlu0 %726  ;;  %v819_v2 = vsel %vm321_vm4, %v817_v54, %v779_v40 }
 0x156   : > { %v745_v41 = vsel %vm333_vm8, %v743_v38, %v727_v42 }
 0x157   : > { %1557 = vmatmul.mubr.msk.f32.gmra.mrb[2].mxu1 %vm915_vm9, %v745_v41 }
 0x158   : > { %v841_v43 = vpop.permute.xlu1 %840 }
 0x159   : > { %v783_v44 = vpop.permute.xlu0 %782  ;;  %v894_v10 = vsel %vm312_vm1, %v1971_v45, %v841_v43 }
 0x15a   : > { %v820_v57 = vsel %vm324_vm5, %v818_v56, %v783_v44 }
 0x15c   : > { %v791_v46 = vpop.permute.xlu1 %790 }
 0x15d   : > { %v785_v47 = vpop.permute.xlu0 %784  ;;  %v822_v58 = vsel %vm327_vm6, %v820_v57, %v791_v46 }
 0x15e   : > { %v821_v3 = vsel %vm324_vm5, %v819_v2, %v785_v47 }
 0x160   : > { %v847_v50 = vpop.permute.xlu1 %846 }
 0x161   : > { %v843_v17 = vpop.permute.xlu0 %842  ;;  %v896_v15 = vsel %vm315_vm2, %v894_v10, %v847_v50 }
 0x162   : > { %v895_v13 = vsel %vm312_vm1, %v1994_v59, %v843_v17 }
 0x164   : > { %v799_v39 = vpop.permute.xlu1 %798 }
 0x165   : > { %v793_v49 = vpop.permute.xlu0 %792  ;;  %v824_v29 = vsel %vm330_vm7, %v822_v58, %v799_v39 }
 0x166   : > { %v823_v6 = vsel %vm327_vm6, %v821_v3, %v793_v49 }
 0x168   : > { %v853_v52 = vpop.permute.xlu1 %852 }
 0x169   : > { %v849_v53 = vpop.permute.xlu0 %848  ;;  %v898_v19 = vsel %vm318_vm3, %v896_v15, %v853_v52 }
 0x16a   : > { %v897_v16 = vsel %vm315_vm2, %v895_v13, %v849_v53 }
 0x16c   : > { %v807_v55 = vpop.permute.xlu1 %806 }
 0x16d   : > { %v801_v61 = vpop.permute.xlu0 %800  ;;  %v826_v62 = vsel %vm333_vm8, %v824_v29, %v807_v55 }
 0x16e   : > { %1559 = vmatprep.mubr.msk.f32.mxu1 %vm915_vm9, %v826_v62  ;;  %v825_v31 = vsel %vm330_vm7, %v823_v6, %v801_v61 }
 0x170   : > { %v859_v63 = vpop.permute.xlu1 %858 }
 0x171   : > { %v855_v1 = vpop.permute.xlu0 %854  ;;  %v900_v24 = vsel %vm321_vm4, %v898_v19, %v859_v63 }
 0x172   : > { %v899_v20 = vsel %vm318_vm3, %v897_v16, %v855_v1 }
 0x174   : > { %v861_v0 = vpop.permute.xlu1 %860 }
 0x175   : > { %v809_v7 = vpop.permute.xlu0 %808  ;;  %v901_v26 = vsel %vm321_vm4, %v899_v20, %v861_v0 }
 0x176   : > { %v827_v14 = vsel %vm333_vm8, %v825_v31, %v809_v7 }
 0x177   : > { %1560 = vmatmul.mubr.msk.f32.gmra.mrb[4].mxu1 %vm915_vm9, %v827_v14 }
 0x178   : > { %v867_v8 = vpop.permute.xlu1 %866 }
 0x179   : > { %v865_v11 = vpop.permute.xlu0 %864  ;;  %v903_v27 = vsel %vm324_vm5, %v901_v26, %v867_v8 }
 0x17a   : > { %v902_v45 = vsel %vm324_vm5, %v900_v24, %v865_v11 }
 0x17c   : > { %v875_v12 = vpop.permute.xlu1 %874 }
 0x17d   : > { %v873_v23 = vpop.permute.xlu0 %872  ;;  %v905_v59 = vsel %vm327_vm6, %v903_v27, %v875_v12 }
 0x17e   : > { %v904_v30 = vsel %vm327_vm6, %v902_v45, %v873_v23 }
 0x180   : > { %v883_v21 = vpop.permute.xlu1 %882 }
 0x181   : > { %v881_v22 = vpop.permute.xlu0 %880  ;;  %v907_v33 = vsel %vm330_vm7, %v905_v59, %v883_v21 }
 0x182   : > { %v906_v9 = vsel %vm330_vm7, %v904_v30, %v881_v22 }
 0x184   : > { %v891_v35 = vpop.permute.xlu1 %890 }
 0x185   : > { %v889_v32 = vpop.permute.xlu0 %888  ;;  %v909_v25 = vsel %vm333_vm8, %v907_v33, %v891_v35 }
 0x186   : > { %v908_v18 = vsel %vm333_vm8, %v906_v9, %v889_v32 }
 0x187   : > { %1562 = vmatprep.mubr.msk.f32.mxu1 %vm915_vm9, %v908_v18 }
 0x188   : > { %1563 = vmatmul.mubr.msk.f32.gmra.mrb[6].mxu1 %vm915_vm9, %v909_v25 }
 0x18a   : > { %v1543_v28 = vpop.f32.mrb[0].mxu0 }
 0x18b   : > { %v1135_v34 = vmul.f32 %v1543_v28, %v1543_v28  ;;  %v1034_v36 = vpop.f32.mrb[1].mxu0 }
 0x18c   : > { %v1113_v37 = vadd.f32 %v1543_v28, %v1034_v36  ;;  %v1134_v38 = vmul.f32 %v1034_v36, %v1034_v36  ;;  %1174 = vxpose.xlu0.b32.start [1/16] (narrow) %v1034_v36, 8 }
 0x18e   : > { %v1150_v40 = vadd.f32 %v1135_v34, %v1134_v38 }
 0x190   : > { %1175 = vxpose.xlu0.b32.cont [2/16] (narrow) %v1543_v28, 8 }
 0x1aa   : > { %v1546_v42 = vpop.f32.mrb[2].mxu0 }
 0x1ab   : > { %v1044_v41 = vpop.f32.mrb[3].mxu0  ;;  %v1137_v46 = vmul.f32 %v1546_v42, %v1546_v42 }
 0x1ac   : > { %v1114_v43 = vadd.f32 %v1113_v37, %v1044_v41  ;;  %v1136_v44 = vmul.f32 %v1044_v41, %v1044_v41  ;;  %1176 = vxpose.xlu0.b32.cont [3/16] (narrow) %v1044_v41, 8 }
 0x1ae   : > { %v1151_v47 = vadd.f32 %v1150_v40, %v1136_v44  ;;  %v1115_v50 = vadd.f32 %v1546_v42, %v1114_v43 }
 0x1b0   : > { %1177 = vxpose.xlu0.b32.cont [4/16] (narrow) %v1546_v42, 8  ;;  %v1152_v17 = vadd.f32 %v1151_v47, %v1137_v46 }
 0x1ca   : > { %v1549_v39 = vpop.f32.mrb[4].mxu0 }
 0x1cb   : > { %v1054_v49 = vpop.f32.mrb[5].mxu0  ;;  %v1139_v51 = vmul.f32 %v1549_v39, %v1549_v39 }
 0x1cc   : > { %v1116_v5 = vadd.f32 %v1115_v50, %v1054_v49  ;;  %v1138_v48 = vmul.f32 %v1054_v49, %v1054_v49  ;;  %1178 = vxpose.xlu0.b32.cont [5/16] (narrow) %v1054_v49, 8 }
 0x1ce   : > { %v1153_v52 = vadd.f32 %v1152_v17, %v1138_v48  ;;  %v1117_v53 = vadd.f32 %v1549_v39, %v1116_v5 }
 0x1d0   : > { %1179 = vxpose.xlu0.b32.cont [6/16] (narrow) %v1549_v39, 8  ;;  %v1154_v56 = vadd.f32 %v1153_v52, %v1139_v51 }
 0x1ea   : > { %v1552_v57 = vpop.f32.mrb[6].mxu0 }
 0x1eb   : > { %v1064_v58 = vpop.f32.mrb[7].mxu0  ;;  %v1141_v61 = vmul.f32 %v1552_v57, %v1552_v57 }
 0x1ec   : > { %v1118_v29 = vadd.f32 %v1117_v53, %v1064_v58  ;;  %v1140_v55 = vmul.f32 %v1064_v58, %v1064_v58  ;;  %1180 = vxpose.xlu0.b32.cont [7/16] (narrow) %v1064_v58, 8 }
 0x1ee   : > { %v1119_v62 = vadd.f32 %v1552_v57, %v1118_v29  ;;  %v1155_v60 = vadd.f32 %v1154_v56, %v1140_v55 }
 0x1f0   : > { %v1156_v4 = vadd.f32 %v1155_v60, %v1141_v61  ;;  %1181 = vxpose.xlu0.b32.cont [8/16] (narrow) %v1552_v57, 8 }
 0x20a   : > { %v1555_v54 = vpop.f32.mrb[0].mxu1 }
 0x20b   : > { %v1074_v63 = vpop.f32.mrb[1].mxu1  ;;  %v1143_v3 = vmul.f32 %v1555_v54, %v1555_v54 }
 0x20c   : > { %v1120_v1 = vadd.f32 %v1119_v62, %v1074_v63  ;;  %v1142_v2 = vmul.f32 %v1074_v63, %v1074_v63  ;;  %1182 = vxpose.xlu0.b32.cont [9/16] (narrow) %v1074_v63, 8 }
 0x20e   : > { %v1157_v6 = vadd.f32 %v1156_v4, %v1142_v2  ;;  %v1121_v31 = vadd.f32 %v1555_v54, %v1120_v1 }
 0x210   : > { %1183 = vxpose.xlu0.b32.cont [10/16] (narrow) %v1555_v54, 8  ;;  %v1158_v0 = vadd.f32 %v1157_v6, %v1143_v3 }
 0x22a   : > { %v1558_v7 = vpop.f32.mrb[2].mxu1 }
 0x22b   : > { %v1084_v14 = vpop.f32.mrb[3].mxu1  ;;  %v1145_v12 = vmul.f32 %v1558_v7, %v1558_v7 }
 0x22c   : > { %v1122_v8 = vadd.f32 %v1121_v31, %v1084_v14  ;;  %v1144_v11 = vmul.f32 %v1084_v14, %v1084_v14  ;;  %1184 = vxpose.xlu0.b32.cont [11/16] (narrow) %v1084_v14, 8 }
 0x22e   : > { %v1159_v23 = vadd.f32 %v1158_v0, %v1144_v11  ;;  %v1123_v10 = vadd.f32 %v1558_v7, %v1122_v8 }
 0x230   : > { %1185 = vxpose.xlu0.b32.cont [12/16] (narrow) %v1558_v7, 8  ;;  %v1160_v13 = vadd.f32 %v1159_v23, %v1145_v12 }
 0x24a   : > { %v1561_v15 = vpop.f32.mrb[4].mxu1 }
 0x24b   : > { %v1094_v16 = vpop.f32.mrb[5].mxu1  ;;  %v1147_v21 = vmul.f32 %v1561_v15, %v1561_v15 }
 0x24c   : > { %v1124_v19 = vadd.f32 %v1123_v10, %v1094_v16  ;;  %v1146_v20 = vmul.f32 %v1094_v16, %v1094_v16  ;;  %1186 = vxpose.xlu0.b32.cont [13/16] (narrow) %v1094_v16, 8 }
 0x24e   : > { %v1161_v22 = vadd.f32 %v1160_v13, %v1146_v20  ;;  %v1125_v24 = vadd.f32 %v1561_v15, %v1124_v19 }
 0x250   : > { %1187 = vxpose.xlu0.b32.cont [14/16] (narrow) %v1561_v15, 8  ;;  %v1162_v26 = vadd.f32 %v1161_v22, %v1147_v21 }
 0x25b   : > { %v1564_v27 = vpop.f32.mrb[6].mxu1 }
 0x25c   : > { %v1104_v45 = vpop.f32.mrb[7].mxu1  ;;  %v1149_v33 = vmul.f32 %v1564_v27, %v1564_v27 }
 0x25d   : > { %v1126_v59 = vadd.f32 %v1125_v24, %v1104_v45  ;;  %v1148_v30 = vmul.f32 %v1104_v45, %v1104_v45  ;;  %1188 = vxpose.xlu0.b32.cont [15/16] (narrow) %v1104_v45, 8 }
 0x25f   : > { %v1127_v9 = vadd.f32 %v1564_v27, %v1126_v59  ;;  %v1163_v35 = vadd.f32 %v1162_v26, %v1148_v30 }
 0x261   : > { %v1128_v32 = vrot.slane %v1127_v9, 4  ;;  %v1164_v25 = vadd.f32 %v1163_v35, %v1149_v33  ;;  %1189 = vxpose.xlu0.b32.end [16/16] (narrow) %v1564_v27, 8 }
 0x263   : > { %v1129_v18 = vadd.f32 %v1128_v32, %v1127_v9  ;;  %v1165_v28 = vrot.slane %v1164_v25, 4 }
 0x265   : > { %v1130_v34 = vrot.slane %v1129_v18, 2  ;;  %v1166_v36 = vadd.f32 %v1165_v28, %v1164_v25 }
 0x267   : > { %v1131_v37 = vadd.f32 %v1130_v34, %v1129_v18  ;;  %v1167_v38 = vrot.slane %v1166_v36, 2 }
 0x269   : > { %v1132_v40 = vrot.slane %v1131_v37, 1  ;;  %v1168_v42 = vadd.f32 %v1167_v38, %v1166_v36 }
 0x26b   : > { %v1169_v41 = vrot.slane %v1168_v42, 1  ;;  %v1133_v43 = vadd.f32 %v1132_v40, %v1131_v37 }
 0x26d   : > { %v1170_v44 = vadd.f32 %v1169_v41, %v1168_v42 }
 0x26f   : > { %v1172_v46 = vsel %vm1171_vm10, %v1133_v43, %v1170_v44 }
 0x270   : > { %1173 = vst [vmem:[%s211_s28] sm:$0x3] %v1172_v46 }
 0x2a5   : > { %v1190_v47 = vpop.trf.xlu0 }
 0x2a6   : > { %1206 = vst [vmem:[%s203_s4] sm:$0xff] %v1190_v47 }
 0x2a7 PF: > { %s14_s16 = sadd.s32 1, %s1666_s16   ;;  %s2225_s12 = smov %s1658_s14 }
 0x2a8   : > { %p11_p7 = scmp.ge.s32.totalorder %s14_s16, 6   ;;  %s2226_s13 = smov %s1662_s15 }
 0x2a9   : > { %s2227_s14 = smov %s2230_s17  ;;  %s2228_s15 = smov %s2234_s18 }
 0x2aa   :  { %13 = sbr.rel (!%p11_p7) target bundleno = 3 (0x3), region = 100 }

</bundles_post_ra>
